<compile_context>
chip_gen: v5e
topology: v5e:2x2
jax: 0.10.0
libtpu: 0.0.40
codegen_flags: <defaults>
</compile_context>

<pallas_src>
import jax
import jax.numpy as jnp
from jax.experimental import pallas as pl
from jax.experimental.pallas import tpu as pltpu


def _cat_slice_cat_kernel(x_ref, o_ref):
    # x_ref: (Bt, S, D)        -- input slab, fetched from HBM exactly once
    # o_ref: (2, Bt, 2S-3, D)  -- both batch copies of the output slab
    S = x_ref.shape[1]
    x = x_ref[...]
    # Build the (2S-3)-row slab once; the sublane-misaligned join at row S-2
    # is paid here (in vregs/VMEM), and both stores below are contiguous.
    slab = jnp.concatenate([x[:, : S - 2, :], x[:, : S - 1, :]], axis=1)
    o_ref[0, ...] = slab
    o_ref[1, ...] = slab


def cat_slice_cat(x3, *, vmem_working_set_bytes=12 * 1024 * 1024):
    B, S, D = x3.shape
    out_S = 2 * S - 3

    # Pick the batch-tile Bt as large as the double-buffered working set
    # (input tile + 2-copy output tile) allows, capped at B and constrained
    # to divide B so every block is full.
    itemsize = jnp.dtype(x3.dtype).itemsize
    per_row = (S * D + 2 * out_S * D) * itemsize
    bt = max(1, min(B, vmem_working_set_bytes // (2 * per_row)))
    while B % bt != 0:
        bt -= 1

    grid = (B // bt,)
    out4 = pl.pallas_call(
        _cat_slice_cat_kernel,
        out_shape=jax.ShapeDtypeStruct((2, B, out_S, D), x3.dtype),
        grid_spec=pltpu.PrefetchScalarGridSpec(
            num_scalar_prefetch=0,
            grid=grid,
            in_specs=[pl.BlockSpec((bt, S, D), lambda i: (i, 0, 0))],
            out_specs=pl.BlockSpec((2, bt, out_S, D), lambda i: (0, i, 0, 0)),
        ),
        compiler_params=pltpu.CompilerParams(
            dimension_semantics=("parallel",),
            vmem_limit_bytes=32 * 1024 * 1024,
        ),
    )(x3)
    # (2, B, out_S, D) -> (2B, out_S, D): contiguous (free) reshape; output
    # row r corresponds to input row r % B, matching concat([x3, x3], axis=0).
    return out4.reshape(2 * B, out_S, D)


def _reference(x3):
    # pure-JAX reference for the same well-defined semantics
    v1 = jnp.concatenate([x3, x3], axis=0)
    v1 = v1[:, :-1, :]
    v2 = v1[:, :-1, :]
    return jnp.concatenate([v2, v1], axis=1)


if __name__ == "__main__":
    key = jax.random.PRNGKey(0)
    # shape matches the original module's x3 = torch.randn(8, 128, 128)
    B, S, D = 8, 128, 128
    x3 = jax.random.normal(key, (B, S, D), dtype=jnp.float32)

    out = jax.block_until_ready(cat_slice_cat(x3))

    ref = _reference(x3)
    assert out.shape == (2 * B, 2 * S - 3, D), out.shape
    assert jnp.array_equal(out, ref), "mismatch vs reference"

    print("KERNEL_OK")
</pallas_src>

<mosaic_0001>
module attributes {stable_mosaic.version = 11 : i64} {
  func.func @_cat_slice_cat_kernel(%arg0: i32, %arg1: memref<8x128x128xf32, #tpu.memory_space<vmem>>, %arg2: memref<2x8x253x128xf32, #tpu.memory_space<vmem>>) attributes {dimension_semantics = [#tpu.dimension_semantics<parallel>], iteration_bounds = array<i64: 1>, scalar_prefetch = 0 : i64, scratch_operands = 0 : i64, tpu.core_type = #tpu.core_type<tc>, window_params = [{transform_indices = @transform_0, window_bounds = array<i64: 8, 128, 128>}, {transform_indices = @transform_1, window_bounds = array<i64: 2, 8, 253, 128>}]} {
    %c0 = arith.constant 0 : index
    %c0_0 = arith.constant 0 : index
    %c0_1 = arith.constant 0 : index
    %0 = vector.load %arg1[%c0, %c0_0, %c0_1] : memref<8x128x128xf32, #tpu.memory_space<vmem>>, vector<8x128x128xf32>
    %1 = vector.extract_strided_slice %0 {offsets = [0, 0, 0], sizes = [8, 126, 128], strides = [1, 1, 1]} : vector<8x128x128xf32> to vector<8x126x128xf32>
    %2 = vector.extract_strided_slice %0 {offsets = [0, 0, 0], sizes = [8, 127, 128], strides = [1, 1, 1]} : vector<8x128x128xf32> to vector<8x127x128xf32>
    %3 = tpu.concatenate %1, %2 in 1 : vector<8x126x128xf32>, vector<8x127x128xf32> -> vector<8x253x128xf32>
    %c0_2 = arith.constant 0 : index
    %c0_3 = arith.constant 0 : index
    %c0_4 = arith.constant 0 : index
    %c0_5 = arith.constant 0 : index
    %4 = vector.load %arg2[%c0_2, %c0_3, %c0_4, %c0_5] : memref<2x8x253x128xf32, #tpu.memory_space<vmem>>, vector<1x8x253x128xf32>
    %5 = vector.shape_cast %4 : vector<1x8x253x128xf32> to vector<8x253x128xf32>
    %6 = vector.shape_cast %3 : vector<8x253x128xf32> to vector<1x8x253x128xf32>
    tpu.vector_store %arg2[%c0_2, %c0_3, %c0_4, %c0_5], %6 {strides = array<i32>} : memref<2x8x253x128xf32, #tpu.memory_space<vmem>>, vector<1x8x253x128xf32>,
    %c1 = arith.constant 1 : index
    %c0_6 = arith.constant 0 : index
    %c0_7 = arith.constant 0 : index
    %c0_8 = arith.constant 0 : index
    %7 = vector.load %arg2[%c1, %c0_6, %c0_7, %c0_8] : memref<2x8x253x128xf32, #tpu.memory_space<vmem>>, vector<1x8x253x128xf32>
    %8 = vector.shape_cast %7 : vector<1x8x253x128xf32> to vector<8x253x128xf32>
    %9 = vector.shape_cast %3 : vector<8x253x128xf32> to vector<1x8x253x128xf32>
    tpu.vector_store %arg2[%c1, %c0_6, %c0_7, %c0_8], %9 {strides = array<i32>} : memref<2x8x253x128xf32, #tpu.memory_space<vmem>>, vector<1x8x253x128xf32>,
    return
  }
  func.func @transform_0(%arg0: i32) -> (i32, i32, i32) {
    %c0_i32 = arith.constant 0 : i32
    %c0_i32_0 = arith.constant 0 : i32
    %c0_i32_1 = arith.constant 0 : i32
    return %arg0, %c0_i32, %c0_i32_0 : i32, i32, i32
  }
  func.func @transform_1(%arg0: i32) -> (i32, i32, i32, i32) {
    %c0_i32 = arith.constant 0 : i32
    %c0_i32_0 = arith.constant 0 : i32
    %c0_i32_1 = arith.constant 0 : i32
    %c0_i32_2 = arith.constant 0 : i32
    return %c0_i32, %arg0, %c0_i32_0, %c0_i32_1 : i32, i32, i32, i32
  }
}

</mosaic_0001>

<bundles_post_ra>
// kernel: tpu_custom_call.1
= control target key start
LH: loop header
LB: loop body
LE: loop exit
PB: predicated region body
PF: predicated region fallthrough
CT: control target
= control target key end

     0   :  { %6 = vsyncpa [#allocation3], 0  ;;  %s1476_s9 = smov [#allocation2]   ;;  %s1477_s11 = smov 128   ;;  %s3481_s0 = inlined_call_operand.hbm [shape: f32[8,128,128], index: 0, kind: input, shape index: {}]   ;;  %s3482_s1 = inlined_call_operand.vmem [shape: f32[2,8,253,128], index: 1, kind: output, shape index: {}]  }
   0x1   :  { %s11_s8 = sshll.u32 %s3481_s0, 4  ;;  %s13_s10 = sshll.u32 %s1476_s9, 4  ;;  %s12_s8 = int_to_ptr.hbm [resolvable:$true] %s11_s8  ;;  %s14_s10 = int_to_ptr.vmem [resolvable:$true] %s13_s10 }
   0x2   :  { %s1478_s12 = smov 8  }
   0x3   :  { %19 = dma.hbm_to_vmem [thread:$0]  %s12_s8, 16384, %s14_s10, [#allocation3], %s1477_s11, %s1477_s11, %s1478_s12  }
   0x4   :  { %1474 = dma.done.wait [#allocation3], 16384  }
   0x5   :  { %1475 = vsyncadd [#allocation3], 4294950912  ;;  %v24_v0 = vld [vmem:[#allocation2] sm:$0xff]  ;;  %v25_v1 = vld [vmem:[#allocation2 + $0x8] sm:$0xff]  ;;  %vm280_vm0 = vcmask 1045504  }
   0x6   :  { %673 = vst [vmem:[%s3482_s1] sm:$0xff] %v24_v0  ;;  %v26_v2 = vld [vmem:[#allocation2 + $0x10] sm:$0xff]  ;;  %v27_v3 = vld [vmem:[#allocation2 + $0x18] sm:$0xff]  ;;  %v28_v4 = vld [vmem:[#allocation2 + $0x20] sm:$0xff]  ;;  %v281_v12 = vrot.slane %v24_v0, 2  ;;  %v282_v16 = vrot.slane %v25_v1, 2 }
   0x7   :  { %1191 = vst [vmem:[%s3482_s1 + $0x800] sm:$0xff] %v24_v0  ;;  %v29_v5 = vld [vmem:[#allocation2 + $0x28] sm:$0xff]  ;;  %v1528_v6 = vld [vmem:[#allocation2 + $0x30] sm:$0xff]  ;;  %v1538_v7 = vld [vmem:[#allocation2 + $0x38] sm:$0xff]  ;;  %v284_v20 = vrot.slane %v26_v2, 2  ;;  %v286_v21 = vrot.slane %v27_v3, 2 }
   0x8   :  { %674 = vst [vmem:[%s3482_s1 + $0x8] sm:$0xff] %v25_v1  ;;  %v1548_v8 = vld [vmem:[#allocation2 + $0x40] sm:$0xff]  ;;  %v1558_v9 = vld [vmem:[#allocation2 + $0x48] sm:$0xff]  ;;  %v1568_v10 = vld [vmem:[#allocation2 + $0x50] sm:$0xff]  ;;  %v283_v22 = vsel %vm280_vm0, %v281_v12, %v282_v16  ;;  %v288_v23 = vrot.slane %v28_v4, 2  ;;  %v290_v25 = vrot.slane %v29_v5, 2 }
   0x9   :  { %1192 = vst [vmem:[%s3482_s1 + $0x808] sm:$0xff] %v25_v1  ;;  %v1578_v11 = vld [vmem:[#allocation2 + $0x58] sm:$0xff]  ;;  %v1588_v13 = vld [vmem:[#allocation2 + $0x60] sm:$0xff]  ;;  %v1598_v15 = vld [vmem:[#allocation2 + $0x68] sm:$0xff]  ;;  %v285_v24 = vsel %vm280_vm0, %v282_v16, %v284_v20  ;;  %v287_v26 = vsel %vm280_vm0, %v284_v20, %v286_v21  ;;  %v292_v27 = vrot.slane %v1528_v6, 2  ;;  %v294_v29 = vrot.slane %v1538_v7, 2 }
   0xa   :  { %675 = vst [vmem:[%s3482_s1 + $0x10] sm:$0xff] %v26_v2  ;;  %v39_v14 = vld [vmem:[#allocation2 + $0x78] sm:$0xff]  ;;  %v1608_v17 = vld [vmem:[#allocation2 + $0x70] sm:$0xff]  ;;  %v289_v28 = vsel %vm280_vm0, %v286_v21, %v288_v23  ;;  %v291_v30 = vsel %vm280_vm0, %v288_v23, %v290_v25  ;;  %v296_v31 = vrot.slane %v1548_v8, 2  ;;  %v298_v33 = vrot.slane %v1558_v9, 2  ;;  %v40_v48 = vld [vmem:[#allocation2 + $0x80] sm:$0xff] }
   0xb   :  { %1193 = vst [vmem:[%s3482_s1 + $0x810] sm:$0xff] %v26_v2  ;;  %v310_v18 = vrot.slane %v39_v14, 2  ;;  %v665_v19 = vsel %vm280_vm0, %v39_v14, %v281_v12  ;;  %v293_v32 = vsel %vm280_vm0, %v290_v25, %v292_v27  ;;  %v295_v34 = vsel %vm280_vm0, %v292_v27, %v294_v29  ;;  %v41_v49 = vld [vmem:[#allocation2 + $0x88] sm:$0xff]  ;;  %v42_v50 = vld [vmem:[#allocation2 + $0x90] sm:$0xff]  ;;  %v43_v51 = vld [vmem:[#allocation2 + $0x98] sm:$0xff] }
   0xc   :  { %676 = vst [vmem:[%s3482_s1 + $0x18] sm:$0xff] %v27_v3  ;;  %v300_v35 = vrot.slane %v1568_v10, 2  ;;  %v297_v36 = vsel %vm280_vm0, %v294_v29, %v296_v31  ;;  %v302_v37 = vrot.slane %v1578_v11, 2  ;;  %v299_v38 = vsel %vm280_vm0, %v296_v31, %v298_v33  ;;  %v44_v52 = vld [vmem:[#allocation2 + $0xa0] sm:$0xff]  ;;  %v45_v53 = vld [vmem:[#allocation2 + $0xa8] sm:$0xff]  ;;  %v46_v54 = vld [vmem:[#allocation2 + $0xb0] sm:$0xff] }
   0xd   :  { %1194 = vst [vmem:[%s3482_s1 + $0x818] sm:$0xff] %v27_v3  ;;  %v304_v39 = vrot.slane %v1588_v13, 2  ;;  %v306_v41 = vrot.slane %v1598_v15, 2  ;;  %v308_v43 = vrot.slane %v1608_v17, 2  ;;  %v1787_v55 = vld [vmem:[#allocation2 + $0xb8] sm:$0xff]  ;;  %v1797_v56 = vld [vmem:[#allocation2 + $0xc0] sm:$0xff] }
   0xe   :  { %677 = vst [vmem:[%s3482_s1 + $0x20] sm:$0xff] %v28_v4  ;;  %v301_v40 = vsel %vm280_vm0, %v298_v33, %v300_v35  ;;  %v303_v42 = vsel %vm280_vm0, %v300_v35, %v302_v37  ;;  %v1807_v57 = vld [vmem:[#allocation2 + $0xc8] sm:$0xff]  ;;  %v1817_v58 = vld [vmem:[#allocation2 + $0xd0] sm:$0xff]  ;;  %v1827_v59 = vld [vmem:[#allocation2 + $0xd8] sm:$0xff]  ;;  %v312_v60 = vrot.slane %v40_v48, 2  ;;  %v313_v0 = vrot.slane %v41_v49, 2 }
   0xf   :  { %1195 = vst [vmem:[%s3482_s1 + $0x820] sm:$0xff] %v28_v4  ;;  %v305_v44 = vsel %vm280_vm0, %v302_v37, %v304_v39  ;;  %v307_v45 = vsel %vm280_vm0, %v304_v39, %v306_v41  ;;  %v309_v46 = vsel %vm280_vm0, %v306_v41, %v308_v43  ;;  %v311_v47 = vsel %vm280_vm0, %v308_v43, %v310_v18  ;;  %v1837_v61 = vld [vmem:[#allocation2 + $0xe0] sm:$0xff]  ;;  %v55_v62 = vld [vmem:[#allocation2 + $0xf8] sm:$0xff]  ;;  %v1847_v63 = vld [vmem:[#allocation2 + $0xe8] sm:$0xff] }
  0x10   :  { %678 = vst [vmem:[%s3482_s1 + $0x28] sm:$0xff] %v29_v5  ;;  %v1857_v1 = vld [vmem:[#allocation2 + $0xf0] sm:$0xff]  ;;  %v341_v2 = vrot.slane %v55_v62, 2  ;;  %v666_v3 = vsel %vm280_vm0, %v55_v62, %v312_v60  ;;  %v315_v4 = vrot.slane %v42_v50, 2  ;;  %v333_v21 = vrot.slane %v1827_v59, 2  ;;  %v57_v33 = vld [vmem:[#allocation2 + $0x108] sm:$0xff] }
  0x11   :  { %1196 = vst [vmem:[%s3482_s1 + $0x828] sm:$0xff] %v29_v5  ;;  %v317_v5 = vrot.slane %v43_v51, 2  ;;  %v335_v23 = vrot.slane %v1837_v61, 2  ;;  %v337_v25 = vrot.slane %v1847_v63, 2  ;;  %v339_v27 = vrot.slane %v1857_v1, 2  ;;  %v59_v35 = vld [vmem:[#allocation2 + $0x118] sm:$0xff] }
  0x12   :  { %679 = vst [vmem:[%s3482_s1 + $0x30] sm:$0xff] %v1528_v6  ;;  %v61_v37 = vld [vmem:[#allocation2 + $0x128] sm:$0xff]  ;;  %v2035_v39 = vld [vmem:[#allocation2 + $0x138] sm:$0xff] }
  0x13   :  { %1197 = vst [vmem:[%s3482_s1 + $0x830] sm:$0xff] %v1528_v6  ;;  %v314_v6 = vsel %vm280_vm0, %v312_v60, %v313_v0  ;;  %v338_v29 = vsel %vm280_vm0, %v335_v23, %v337_v25  ;;  %v342_v31 = vsel %vm280_vm0, %v339_v27, %v341_v2  ;;  %v2055_v41 = vld [vmem:[#allocation2 + $0x148] sm:$0xff]  ;;  %v2075_v43 = vld [vmem:[#allocation2 + $0x158] sm:$0xff] }
  0x14   :  { %680 = vst [vmem:[%s3482_s1 + $0x38] sm:$0xff] %v1538_v7 }
  0x15   :  { %1198 = vst [vmem:[%s3482_s1 + $0x838] sm:$0xff] %v1538_v7  ;;  %v319_v7 = vrot.slane %v44_v52, 2 }
  0x16   :  { %681 = vst [vmem:[%s3482_s1 + $0x40] sm:$0xff] %v1548_v8 }
  0x17   :  { %1199 = vst [vmem:[%s3482_s1 + $0x840] sm:$0xff] %v1548_v8  ;;  %v316_v8 = vsel %vm280_vm0, %v313_v0, %v315_v4  ;;  %v320_v12 = vsel %vm280_vm0, %v317_v5, %v319_v7 }
  0x18   :  { %682 = vst [vmem:[%s3482_s1 + $0x48] sm:$0xff] %v1558_v9 }
  0x19   :  { %1200 = vst [vmem:[%s3482_s1 + $0x848] sm:$0xff] %v1558_v9  ;;  %v321_v9 = vrot.slane %v45_v53, 2 }
  0x1a   :  { %683 = vst [vmem:[%s3482_s1 + $0x50] sm:$0xff] %v1568_v10 }
  0x1b   :  { %1201 = vst [vmem:[%s3482_s1 + $0x850] sm:$0xff] %v1568_v10  ;;  %v318_v10 = vsel %vm280_vm0, %v315_v4, %v317_v5  ;;  %v322_v14 = vsel %vm280_vm0, %v319_v7, %v321_v9  ;;  %v364_v5 = vrot.slane %v2075_v43, 2 }
  0x1c   :  { %684 = vst [vmem:[%s3482_s1 + $0x58] sm:$0xff] %v1578_v11 }
  0x1d   :  { %1202 = vst [vmem:[%s3482_s1 + $0x858] sm:$0xff] %v1578_v11  ;;  %v323_v11 = vrot.slane %v46_v54, 2 }
  0x1e   :  { %685 = vst [vmem:[%s3482_s1 + $0x60] sm:$0xff] %v1588_v13 }
  0x1f   :  { %1203 = vst [vmem:[%s3482_s1 + $0x860] sm:$0xff] %v1588_v13  ;;  %v325_v13 = vrot.slane %v1787_v55, 2  ;;  %v324_v16 = vsel %vm280_vm0, %v321_v9, %v323_v11 }
  0x20   :  { %686 = vst [vmem:[%s3482_s1 + $0x68] sm:$0xff] %v1598_v15 }
  0x21   :  { %1204 = vst [vmem:[%s3482_s1 + $0x868] sm:$0xff] %v1598_v15  ;;  %v327_v15 = vrot.slane %v1797_v56, 2 }
  0x22   :  { %687 = vst [vmem:[%s3482_s1 + $0x70] sm:$0xff] %v1608_v17 }
  0x23   :  { %1205 = vst [vmem:[%s3482_s1 + $0x870] sm:$0xff] %v1608_v17  ;;  %v329_v17 = vrot.slane %v1807_v57, 2  ;;  %v328_v20 = vsel %vm280_vm0, %v325_v13, %v327_v15 }
  0x24   :  { %688 = vst [vmem:[%s3482_s1 + $0x78] sm:$0xff] %v665_v19 }
  0x25   :  { %704 = vst [vmem:[%s3482_s1 + $0xf8] sm:$0x1f] %v310_v18 }
  0x26   :  { %1206 = vst [vmem:[%s3482_s1 + $0x878] sm:$0xff] %v665_v19  ;;  %v331_v19 = vrot.slane %v1817_v58, 2 }
  0x27   :  { %1222 = vst [vmem:[%s3482_s1 + $0x8f8] sm:$0x1f] %v310_v18  ;;  %v326_v18 = vsel %vm280_vm0, %v323_v11, %v325_v13 }
  0x28   :  { %689 = vst [vmem:[%s3482_s1 + $0x80] sm:$0xff] %v283_v22 }
  0x29   :  { %1207 = vst [vmem:[%s3482_s1 + $0x880] sm:$0xff] %v283_v22  ;;  %v330_v22 = vsel %vm280_vm0, %v327_v15, %v329_v17 }
  0x2a   :  { %690 = vst [vmem:[%s3482_s1 + $0x88] sm:$0xff] %v285_v24 }
  0x2b   :  { %1208 = vst [vmem:[%s3482_s1 + $0x888] sm:$0xff] %v285_v24  ;;  %v332_v24 = vsel %vm280_vm0, %v329_v17, %v331_v19  ;;  %v73_v17 = vld [vmem:[#allocation2 + $0x188] sm:$0xff] }
  0x2c   :  { %691 = vst [vmem:[%s3482_s1 + $0x90] sm:$0xff] %v287_v26 }
  0x2d   :  { %1209 = vst [vmem:[%s3482_s1 + $0x890] sm:$0xff] %v287_v26  ;;  %v334_v26 = vsel %vm280_vm0, %v331_v19, %v333_v21  ;;  %v75_v19 = vld [vmem:[#allocation2 + $0x198] sm:$0xff] }
  0x2e   :  { %692 = vst [vmem:[%s3482_s1 + $0x98] sm:$0xff] %v289_v28 }
  0x2f   :  { %1210 = vst [vmem:[%s3482_s1 + $0x898] sm:$0xff] %v289_v28  ;;  %v336_v28 = vsel %vm280_vm0, %v333_v21, %v335_v23  ;;  %v77_v21 = vld [vmem:[#allocation2 + $0x1a8] sm:$0xff]  ;;  %v2283_v23 = vld [vmem:[#allocation2 + $0x1b8] sm:$0xff] }
  0x30   :  { %693 = vst [vmem:[%s3482_s1 + $0xa0] sm:$0xff] %v291_v30 }
  0x31   :  { %1211 = vst [vmem:[%s3482_s1 + $0x8a0] sm:$0xff] %v291_v30  ;;  %v340_v30 = vsel %vm280_vm0, %v337_v25, %v339_v27  ;;  %v2303_v25 = vld [vmem:[#allocation2 + $0x1c8] sm:$0xff]  ;;  %v2323_v27 = vld [vmem:[#allocation2 + $0x1d8] sm:$0xff] }
  0x32   :  { %694 = vst [vmem:[%s3482_s1 + $0xa8] sm:$0xff] %v293_v32 }
  0x33   :  { %1212 = vst [vmem:[%s3482_s1 + $0x8a8] sm:$0xff] %v293_v32  ;;  %v56_v32 = vld [vmem:[#allocation2 + $0x100] sm:$0xff] }
  0x34   :  { %695 = vst [vmem:[%s3482_s1 + $0xb0] sm:$0xff] %v295_v34 }
  0x35   :  { %1213 = vst [vmem:[%s3482_s1 + $0x8b0] sm:$0xff] %v295_v34  ;;  %v58_v34 = vld [vmem:[#allocation2 + $0x110] sm:$0xff] }
  0x36   :  { %696 = vst [vmem:[%s3482_s1 + $0xb8] sm:$0xff] %v297_v36 }
  0x37   :  { %1214 = vst [vmem:[%s3482_s1 + $0x8b8] sm:$0xff] %v297_v36  ;;  %v60_v36 = vld [vmem:[#allocation2 + $0x120] sm:$0xff] }
  0x38   :  { %697 = vst [vmem:[%s3482_s1 + $0xc0] sm:$0xff] %v299_v38 }
  0x39   :  { %1215 = vst [vmem:[%s3482_s1 + $0x8c0] sm:$0xff] %v299_v38  ;;  %v62_v38 = vld [vmem:[#allocation2 + $0x130] sm:$0xff] }
  0x3a   :  { %698 = vst [vmem:[%s3482_s1 + $0xc8] sm:$0xff] %v301_v40 }
  0x3b   :  { %1216 = vst [vmem:[%s3482_s1 + $0x8c8] sm:$0xff] %v301_v40  ;;  %v2045_v40 = vld [vmem:[#allocation2 + $0x140] sm:$0xff] }
  0x3c   :  { %699 = vst [vmem:[%s3482_s1 + $0xd0] sm:$0xff] %v303_v42 }
  0x3d   :  { %1217 = vst [vmem:[%s3482_s1 + $0x8d0] sm:$0xff] %v303_v42  ;;  %v2065_v42 = vld [vmem:[#allocation2 + $0x150] sm:$0xff] }
  0x3e   :  { %700 = vst [vmem:[%s3482_s1 + $0xd8] sm:$0xff] %v305_v44 }
  0x3f   :  { %1218 = vst [vmem:[%s3482_s1 + $0x8d8] sm:$0xff] %v305_v44  ;;  %v343_v44 = vrot.slane %v56_v32, 2 }
  0x40   :  { %701 = vst [vmem:[%s3482_s1 + $0xe0] sm:$0xff] %v307_v45 }
  0x41   :  { %1219 = vst [vmem:[%s3482_s1 + $0x8e0] sm:$0xff] %v307_v45  ;;  %v2085_v45 = vld [vmem:[#allocation2 + $0x160] sm:$0xff] }
  0x42   :  { %702 = vst [vmem:[%s3482_s1 + $0xe8] sm:$0xff] %v309_v46  ;;  %v366_v7 = vrot.slane %v2085_v45, 2 }
  0x43   :  { %1220 = vst [vmem:[%s3482_s1 + $0x8e8] sm:$0xff] %v309_v46  ;;  %v71_v46 = vld [vmem:[#allocation2 + $0x178] sm:$0xff] }
  0x44   :  { %703 = vst [vmem:[%s3482_s1 + $0xf0] sm:$0xff] %v311_v47 }
  0x45   :  { %1221 = vst [vmem:[%s3482_s1 + $0x8f0] sm:$0xff] %v311_v47  ;;  %v2095_v47 = vld [vmem:[#allocation2 + $0x168] sm:$0xff] }
  0x46   :  { %705 = vst [vmem:[%s3482_s1 + $0x100] sm:$0xff] %v40_v48  ;;  %v368_v9 = vrot.slane %v2095_v47, 2 }
  0x47   :  { %1223 = vst [vmem:[%s3482_s1 + $0x900] sm:$0xff] %v40_v48  ;;  %v344_v48 = vrot.slane %v57_v33, 2 }
  0x48   :  { %706 = vst [vmem:[%s3482_s1 + $0x108] sm:$0xff] %v41_v49  ;;  %v369_v13 = vsel %vm280_vm0, %v366_v7, %v368_v9 }
  0x49   :  { %1224 = vst [vmem:[%s3482_s1 + $0x908] sm:$0xff] %v41_v49  ;;  %v2105_v49 = vld [vmem:[#allocation2 + $0x170] sm:$0xff] }
  0x4a   :  { %707 = vst [vmem:[%s3482_s1 + $0x110] sm:$0xff] %v42_v50  ;;  %v370_v11 = vrot.slane %v2105_v49, 2 }
  0x4b   :  { %1225 = vst [vmem:[%s3482_s1 + $0x910] sm:$0xff] %v42_v50  ;;  %v372_v50 = vrot.slane %v71_v46, 2 }
  0x4c   :  { %708 = vst [vmem:[%s3482_s1 + $0x118] sm:$0xff] %v43_v51 }
  0x4d   :  { %1226 = vst [vmem:[%s3482_s1 + $0x918] sm:$0xff] %v43_v51  ;;  %v667_v51 = vsel %vm280_vm0, %v71_v46, %v343_v44  ;;  %v373_v15 = vsel %vm280_vm0, %v370_v11, %v372_v50 }
  0x4e   :  { %709 = vst [vmem:[%s3482_s1 + $0x120] sm:$0xff] %v44_v52 }
  0x4f   :  { %1227 = vst [vmem:[%s3482_s1 + $0x920] sm:$0xff] %v44_v52  ;;  %v346_v52 = vrot.slane %v58_v34, 2 }
  0x50   :  { %710 = vst [vmem:[%s3482_s1 + $0x128] sm:$0xff] %v45_v53 }
  0x51   :  { %1228 = vst [vmem:[%s3482_s1 + $0x928] sm:$0xff] %v45_v53  ;;  %v348_v53 = vrot.slane %v59_v35, 2 }
  0x52   :  { %711 = vst [vmem:[%s3482_s1 + $0x130] sm:$0xff] %v46_v54 }
  0x53   :  { %1229 = vst [vmem:[%s3482_s1 + $0x930] sm:$0xff] %v46_v54  ;;  %v345_v54 = vsel %vm280_vm0, %v343_v44, %v344_v48 }
  0x54   :  { %712 = vst [vmem:[%s3482_s1 + $0x138] sm:$0xff] %v1787_v55 }
  0x55   :  { %1230 = vst [vmem:[%s3482_s1 + $0x938] sm:$0xff] %v1787_v55  ;;  %v350_v55 = vrot.slane %v60_v36, 2 }
  0x56   :  { %713 = vst [vmem:[%s3482_s1 + $0x140] sm:$0xff] %v1797_v56 }
  0x57   :  { %1231 = vst [vmem:[%s3482_s1 + $0x940] sm:$0xff] %v1797_v56  ;;  %v347_v56 = vsel %vm280_vm0, %v344_v48, %v346_v52  ;;  %v351_v60 = vsel %vm280_vm0, %v348_v53, %v350_v55 }
  0x58   :  { %714 = vst [vmem:[%s3482_s1 + $0x148] sm:$0xff] %v1807_v57 }
  0x59   :  { %1232 = vst [vmem:[%s3482_s1 + $0x948] sm:$0xff] %v1807_v57  ;;  %v352_v57 = vrot.slane %v61_v37, 2 }
  0x5a   :  { %715 = vst [vmem:[%s3482_s1 + $0x150] sm:$0xff] %v1817_v58 }
  0x5b   :  { %1233 = vst [vmem:[%s3482_s1 + $0x950] sm:$0xff] %v1817_v58  ;;  %v349_v58 = vsel %vm280_vm0, %v346_v52, %v348_v53  ;;  %v353_v62 = vsel %vm280_vm0, %v350_v55, %v352_v57  ;;  %v395_v53 = vrot.slane %v2323_v27, 2 }
  0x5c   :  { %716 = vst [vmem:[%s3482_s1 + $0x158] sm:$0xff] %v1827_v59 }
  0x5d   :  { %1234 = vst [vmem:[%s3482_s1 + $0x958] sm:$0xff] %v1827_v59  ;;  %v354_v59 = vrot.slane %v62_v38, 2 }
  0x5e   :  { %717 = vst [vmem:[%s3482_s1 + $0x160] sm:$0xff] %v1837_v61 }
  0x5f   :  { %1235 = vst [vmem:[%s3482_s1 + $0x960] sm:$0xff] %v1837_v61  ;;  %v356_v61 = vrot.slane %v2035_v39, 2  ;;  %v355_v0 = vsel %vm280_vm0, %v352_v57, %v354_v59 }
  0x60   :  { %718 = vst [vmem:[%s3482_s1 + $0x168] sm:$0xff] %v1847_v63 }
  0x61   :  { %1236 = vst [vmem:[%s3482_s1 + $0x968] sm:$0xff] %v1847_v63  ;;  %v358_v63 = vrot.slane %v2045_v40, 2 }
  0x62   :  { %719 = vst [vmem:[%s3482_s1 + $0x170] sm:$0xff] %v1857_v1 }
  0x63   :  { %1237 = vst [vmem:[%s3482_s1 + $0x970] sm:$0xff] %v1857_v1  ;;  %v360_v1 = vrot.slane %v2055_v41, 2  ;;  %v359_v4 = vsel %vm280_vm0, %v356_v61, %v358_v63 }
  0x64   :  { %720 = vst [vmem:[%s3482_s1 + $0x178] sm:$0xff] %v666_v3 }
  0x65   :  { %736 = vst [vmem:[%s3482_s1 + $0x1f8] sm:$0x1f] %v341_v2 }
  0x66   :  { %1238 = vst [vmem:[%s3482_s1 + $0x978] sm:$0xff] %v666_v3  ;;  %v362_v3 = vrot.slane %v2065_v42, 2 }
  0x67   :  { %1254 = vst [vmem:[%s3482_s1 + $0x9f8] sm:$0x1f] %v341_v2  ;;  %v357_v2 = vsel %vm280_vm0, %v354_v59, %v356_v61 }
  0x68   :  { %721 = vst [vmem:[%s3482_s1 + $0x180] sm:$0xff] %v314_v6 }
  0x69   :  { %1239 = vst [vmem:[%s3482_s1 + $0x980] sm:$0xff] %v314_v6  ;;  %v361_v6 = vsel %vm280_vm0, %v358_v63, %v360_v1 }
  0x6a   :  { %722 = vst [vmem:[%s3482_s1 + $0x188] sm:$0xff] %v316_v8 }
  0x6b   :  { %1240 = vst [vmem:[%s3482_s1 + $0x988] sm:$0xff] %v316_v8  ;;  %v363_v8 = vsel %vm280_vm0, %v360_v1, %v362_v3  ;;  %v89_v1 = vld [vmem:[#allocation2 + $0x208] sm:$0xff] }
  0x6c   :  { %723 = vst [vmem:[%s3482_s1 + $0x190] sm:$0xff] %v318_v10 }
  0x6d   :  { %1241 = vst [vmem:[%s3482_s1 + $0x990] sm:$0xff] %v318_v10  ;;  %v365_v10 = vsel %vm280_vm0, %v362_v3, %v364_v5  ;;  %v91_v3 = vld [vmem:[#allocation2 + $0x218] sm:$0xff] }
  0x6e   :  { %724 = vst [vmem:[%s3482_s1 + $0x198] sm:$0xff] %v320_v12 }
  0x6f   :  { %1242 = vst [vmem:[%s3482_s1 + $0x998] sm:$0xff] %v320_v12  ;;  %v367_v12 = vsel %vm280_vm0, %v364_v5, %v366_v7  ;;  %v93_v5 = vld [vmem:[#allocation2 + $0x228] sm:$0xff]  ;;  %v2531_v7 = vld [vmem:[#allocation2 + $0x238] sm:$0xff] }
  0x70   :  { %725 = vst [vmem:[%s3482_s1 + $0x1a0] sm:$0xff] %v322_v14 }
  0x71   :  { %1243 = vst [vmem:[%s3482_s1 + $0x9a0] sm:$0xff] %v322_v14  ;;  %v371_v14 = vsel %vm280_vm0, %v368_v9, %v370_v11  ;;  %v2551_v9 = vld [vmem:[#allocation2 + $0x248] sm:$0xff]  ;;  %v2571_v11 = vld [vmem:[#allocation2 + $0x258] sm:$0xff] }
  0x72   :  { %726 = vst [vmem:[%s3482_s1 + $0x1a8] sm:$0xff] %v324_v16 }
  0x73   :  { %1244 = vst [vmem:[%s3482_s1 + $0x9a8] sm:$0xff] %v324_v16  ;;  %v72_v16 = vld [vmem:[#allocation2 + $0x180] sm:$0xff] }
  0x74   :  { %727 = vst [vmem:[%s3482_s1 + $0x1b0] sm:$0xff] %v326_v18 }
  0x75   :  { %1245 = vst [vmem:[%s3482_s1 + $0x9b0] sm:$0xff] %v326_v18  ;;  %v74_v18 = vld [vmem:[#allocation2 + $0x190] sm:$0xff] }
  0x76   :  { %728 = vst [vmem:[%s3482_s1 + $0x1b8] sm:$0xff] %v328_v20 }
  0x77   :  { %1246 = vst [vmem:[%s3482_s1 + $0x9b8] sm:$0xff] %v328_v20  ;;  %v76_v20 = vld [vmem:[#allocation2 + $0x1a0] sm:$0xff] }
  0x78   :  { %729 = vst [vmem:[%s3482_s1 + $0x1c0] sm:$0xff] %v330_v22 }
  0x79   :  { %1247 = vst [vmem:[%s3482_s1 + $0x9c0] sm:$0xff] %v330_v22  ;;  %v78_v22 = vld [vmem:[#allocation2 + $0x1b0] sm:$0xff] }
  0x7a   :  { %730 = vst [vmem:[%s3482_s1 + $0x1c8] sm:$0xff] %v332_v24 }
  0x7b   :  { %1248 = vst [vmem:[%s3482_s1 + $0x9c8] sm:$0xff] %v332_v24  ;;  %v2293_v24 = vld [vmem:[#allocation2 + $0x1c0] sm:$0xff] }
  0x7c   :  { %731 = vst [vmem:[%s3482_s1 + $0x1d0] sm:$0xff] %v334_v26 }
  0x7d   :  { %1249 = vst [vmem:[%s3482_s1 + $0x9d0] sm:$0xff] %v334_v26  ;;  %v2313_v26 = vld [vmem:[#allocation2 + $0x1d0] sm:$0xff] }
  0x7e   :  { %732 = vst [vmem:[%s3482_s1 + $0x1d8] sm:$0xff] %v336_v28 }
  0x7f   :  { %1250 = vst [vmem:[%s3482_s1 + $0x9d8] sm:$0xff] %v336_v28  ;;  %v374_v28 = vrot.slane %v72_v16, 2 }
  0x80   :  { %733 = vst [vmem:[%s3482_s1 + $0x1e0] sm:$0xff] %v338_v29 }
  0x81   :  { %1251 = vst [vmem:[%s3482_s1 + $0x9e0] sm:$0xff] %v338_v29  ;;  %v2333_v29 = vld [vmem:[#allocation2 + $0x1e0] sm:$0xff] }
  0x82   :  { %734 = vst [vmem:[%s3482_s1 + $0x1e8] sm:$0xff] %v340_v30  ;;  %v397_v55 = vrot.slane %v2333_v29, 2 }
  0x83   :  { %1252 = vst [vmem:[%s3482_s1 + $0x9e8] sm:$0xff] %v340_v30  ;;  %v87_v30 = vld [vmem:[#allocation2 + $0x1f8] sm:$0xff] }
  0x84   :  { %735 = vst [vmem:[%s3482_s1 + $0x1f0] sm:$0xff] %v342_v31 }
  0x85   :  { %1253 = vst [vmem:[%s3482_s1 + $0x9f0] sm:$0xff] %v342_v31  ;;  %v2343_v31 = vld [vmem:[#allocation2 + $0x1e8] sm:$0xff] }
  0x86   :  { %737 = vst [vmem:[%s3482_s1 + $0x200] sm:$0xff] %v56_v32  ;;  %v399_v57 = vrot.slane %v2343_v31, 2 }
  0x87   :  { %1255 = vst [vmem:[%s3482_s1 + $0xa00] sm:$0xff] %v56_v32  ;;  %v375_v32 = vrot.slane %v73_v17, 2 }
  0x88   :  { %738 = vst [vmem:[%s3482_s1 + $0x208] sm:$0xff] %v57_v33  ;;  %v400_v61 = vsel %vm280_vm0, %v397_v55, %v399_v57 }
  0x89   :  { %1256 = vst [vmem:[%s3482_s1 + $0xa08] sm:$0xff] %v57_v33  ;;  %v2353_v33 = vld [vmem:[#allocation2 + $0x1f0] sm:$0xff] }
  0x8a   :  { %739 = vst [vmem:[%s3482_s1 + $0x210] sm:$0xff] %v58_v34  ;;  %v401_v59 = vrot.slane %v2353_v33, 2 }
  0x8b   :  { %1257 = vst [vmem:[%s3482_s1 + $0xa10] sm:$0xff] %v58_v34  ;;  %v403_v34 = vrot.slane %v87_v30, 2 }
  0x8c   :  { %740 = vst [vmem:[%s3482_s1 + $0x218] sm:$0xff] %v59_v35 }
  0x8d   :  { %1258 = vst [vmem:[%s3482_s1 + $0xa18] sm:$0xff] %v59_v35  ;;  %v668_v35 = vsel %vm280_vm0, %v87_v30, %v374_v28  ;;  %v404_v63 = vsel %vm280_vm0, %v401_v59, %v403_v34 }
  0x8e   :  { %741 = vst [vmem:[%s3482_s1 + $0x220] sm:$0xff] %v60_v36 }
  0x8f   :  { %1259 = vst [vmem:[%s3482_s1 + $0xa20] sm:$0xff] %v60_v36  ;;  %v377_v36 = vrot.slane %v74_v18, 2 }
  0x90   :  { %742 = vst [vmem:[%s3482_s1 + $0x228] sm:$0xff] %v61_v37 }
  0x91   :  { %1260 = vst [vmem:[%s3482_s1 + $0xa28] sm:$0xff] %v61_v37  ;;  %v379_v37 = vrot.slane %v75_v19, 2 }
  0x92   :  { %743 = vst [vmem:[%s3482_s1 + $0x230] sm:$0xff] %v62_v38 }
  0x93   :  { %1261 = vst [vmem:[%s3482_s1 + $0xa30] sm:$0xff] %v62_v38  ;;  %v376_v38 = vsel %vm280_vm0, %v374_v28, %v375_v32 }
  0x94   :  { %744 = vst [vmem:[%s3482_s1 + $0x238] sm:$0xff] %v2035_v39 }
  0x95   :  { %1262 = vst [vmem:[%s3482_s1 + $0xa38] sm:$0xff] %v2035_v39  ;;  %v381_v39 = vrot.slane %v76_v20, 2 }
  0x96   :  { %745 = vst [vmem:[%s3482_s1 + $0x240] sm:$0xff] %v2045_v40 }
  0x97   :  { %1263 = vst [vmem:[%s3482_s1 + $0xa40] sm:$0xff] %v2045_v40  ;;  %v378_v40 = vsel %vm280_vm0, %v375_v32, %v377_v36  ;;  %v382_v44 = vsel %vm280_vm0, %v379_v37, %v381_v39 }
  0x98   :  { %746 = vst [vmem:[%s3482_s1 + $0x248] sm:$0xff] %v2055_v41 }
  0x99   :  { %1264 = vst [vmem:[%s3482_s1 + $0xa48] sm:$0xff] %v2055_v41  ;;  %v383_v41 = vrot.slane %v77_v21, 2 }
  0x9a   :  { %747 = vst [vmem:[%s3482_s1 + $0x250] sm:$0xff] %v2065_v42 }
  0x9b   :  { %1265 = vst [vmem:[%s3482_s1 + $0xa50] sm:$0xff] %v2065_v42  ;;  %v380_v42 = vsel %vm280_vm0, %v377_v36, %v379_v37  ;;  %v384_v46 = vsel %vm280_vm0, %v381_v39, %v383_v41  ;;  %v426_v37 = vrot.slane %v2571_v11, 2 }
  0x9c   :  { %748 = vst [vmem:[%s3482_s1 + $0x258] sm:$0xff] %v2075_v43 }
  0x9d   :  { %1266 = vst [vmem:[%s3482_s1 + $0xa58] sm:$0xff] %v2075_v43  ;;  %v385_v43 = vrot.slane %v78_v22, 2 }
  0x9e   :  { %749 = vst [vmem:[%s3482_s1 + $0x260] sm:$0xff] %v2085_v45 }
  0x9f   :  { %1267 = vst [vmem:[%s3482_s1 + $0xa60] sm:$0xff] %v2085_v45  ;;  %v387_v45 = vrot.slane %v2283_v23, 2  ;;  %v386_v48 = vsel %vm280_vm0, %v383_v41, %v385_v43 }
  0xa0   :  { %750 = vst [vmem:[%s3482_s1 + $0x268] sm:$0xff] %v2095_v47 }
  0xa1   :  { %1268 = vst [vmem:[%s3482_s1 + $0xa68] sm:$0xff] %v2095_v47  ;;  %v389_v47 = vrot.slane %v2293_v24, 2 }
  0xa2   :  { %751 = vst [vmem:[%s3482_s1 + $0x270] sm:$0xff] %v2105_v49 }
  0xa3   :  { %1269 = vst [vmem:[%s3482_s1 + $0xa70] sm:$0xff] %v2105_v49  ;;  %v391_v49 = vrot.slane %v2303_v25, 2  ;;  %v390_v52 = vsel %vm280_vm0, %v387_v45, %v389_v47 }
  0xa4   :  { %752 = vst [vmem:[%s3482_s1 + $0x278] sm:$0xff] %v667_v51 }
  0xa5   :  { %768 = vst [vmem:[%s3482_s1 + $0x2f8] sm:$0x1f] %v372_v50 }
  0xa6   :  { %1270 = vst [vmem:[%s3482_s1 + $0xa78] sm:$0xff] %v667_v51  ;;  %v393_v51 = vrot.slane %v2313_v26, 2 }
  0xa7   :  { %1286 = vst [vmem:[%s3482_s1 + $0xaf8] sm:$0x1f] %v372_v50  ;;  %v388_v50 = vsel %vm280_vm0, %v385_v43, %v387_v45 }
  0xa8   :  { %753 = vst [vmem:[%s3482_s1 + $0x280] sm:$0xff] %v345_v54 }
  0xa9   :  { %1271 = vst [vmem:[%s3482_s1 + $0xa80] sm:$0xff] %v345_v54  ;;  %v392_v54 = vsel %vm280_vm0, %v389_v47, %v391_v49 }
  0xaa   :  { %754 = vst [vmem:[%s3482_s1 + $0x288] sm:$0xff] %v347_v56 }
  0xab   :  { %1272 = vst [vmem:[%s3482_s1 + $0xa88] sm:$0xff] %v347_v56  ;;  %v394_v56 = vsel %vm280_vm0, %v391_v49, %v393_v51  ;;  %v105_v49 = vld [vmem:[#allocation2 + $0x288] sm:$0xff] }
  0xac   :  { %755 = vst [vmem:[%s3482_s1 + $0x290] sm:$0xff] %v349_v58 }
  0xad   :  { %1273 = vst [vmem:[%s3482_s1 + $0xa90] sm:$0xff] %v349_v58  ;;  %v396_v58 = vsel %vm280_vm0, %v393_v51, %v395_v53  ;;  %v107_v51 = vld [vmem:[#allocation2 + $0x298] sm:$0xff] }
  0xae   :  { %756 = vst [vmem:[%s3482_s1 + $0x298] sm:$0xff] %v351_v60 }
  0xaf   :  { %1274 = vst [vmem:[%s3482_s1 + $0xa98] sm:$0xff] %v351_v60  ;;  %v398_v60 = vsel %vm280_vm0, %v395_v53, %v397_v55  ;;  %v109_v53 = vld [vmem:[#allocation2 + $0x2a8] sm:$0xff]  ;;  %v2779_v55 = vld [vmem:[#allocation2 + $0x2b8] sm:$0xff] }
  0xb0   :  { %757 = vst [vmem:[%s3482_s1 + $0x2a0] sm:$0xff] %v353_v62 }
  0xb1   :  { %1275 = vst [vmem:[%s3482_s1 + $0xaa0] sm:$0xff] %v353_v62  ;;  %v402_v62 = vsel %vm280_vm0, %v399_v57, %v401_v59  ;;  %v2799_v57 = vld [vmem:[#allocation2 + $0x2c8] sm:$0xff]  ;;  %v2819_v59 = vld [vmem:[#allocation2 + $0x2d8] sm:$0xff] }
  0xb2   :  { %758 = vst [vmem:[%s3482_s1 + $0x2a8] sm:$0xff] %v355_v0 }
  0xb3   :  { %1276 = vst [vmem:[%s3482_s1 + $0xaa8] sm:$0xff] %v355_v0  ;;  %v88_v0 = vld [vmem:[#allocation2 + $0x200] sm:$0xff] }
  0xb4   :  { %759 = vst [vmem:[%s3482_s1 + $0x2b0] sm:$0xff] %v357_v2 }
  0xb5   :  { %1277 = vst [vmem:[%s3482_s1 + $0xab0] sm:$0xff] %v357_v2  ;;  %v90_v2 = vld [vmem:[#allocation2 + $0x210] sm:$0xff] }
  0xb6   :  { %760 = vst [vmem:[%s3482_s1 + $0x2b8] sm:$0xff] %v359_v4 }
  0xb7   :  { %1278 = vst [vmem:[%s3482_s1 + $0xab8] sm:$0xff] %v359_v4  ;;  %v92_v4 = vld [vmem:[#allocation2 + $0x220] sm:$0xff] }
  0xb8   :  { %761 = vst [vmem:[%s3482_s1 + $0x2c0] sm:$0xff] %v361_v6 }
  0xb9   :  { %1279 = vst [vmem:[%s3482_s1 + $0xac0] sm:$0xff] %v361_v6  ;;  %v94_v6 = vld [vmem:[#allocation2 + $0x230] sm:$0xff] }
  0xba   :  { %762 = vst [vmem:[%s3482_s1 + $0x2c8] sm:$0xff] %v363_v8 }
  0xbb   :  { %1280 = vst [vmem:[%s3482_s1 + $0xac8] sm:$0xff] %v363_v8  ;;  %v2541_v8 = vld [vmem:[#allocation2 + $0x240] sm:$0xff] }
  0xbc   :  { %763 = vst [vmem:[%s3482_s1 + $0x2d0] sm:$0xff] %v365_v10 }
  0xbd   :  { %1281 = vst [vmem:[%s3482_s1 + $0xad0] sm:$0xff] %v365_v10  ;;  %v2561_v10 = vld [vmem:[#allocation2 + $0x250] sm:$0xff] }
  0xbe   :  { %764 = vst [vmem:[%s3482_s1 + $0x2d8] sm:$0xff] %v367_v12 }
  0xbf   :  { %1282 = vst [vmem:[%s3482_s1 + $0xad8] sm:$0xff] %v367_v12  ;;  %v405_v12 = vrot.slane %v88_v0, 2 }
  0xc0   :  { %765 = vst [vmem:[%s3482_s1 + $0x2e0] sm:$0xff] %v369_v13 }
  0xc1   :  { %1283 = vst [vmem:[%s3482_s1 + $0xae0] sm:$0xff] %v369_v13  ;;  %v2581_v13 = vld [vmem:[#allocation2 + $0x260] sm:$0xff] }
  0xc2   :  { %766 = vst [vmem:[%s3482_s1 + $0x2e8] sm:$0xff] %v371_v14  ;;  %v428_v39 = vrot.slane %v2581_v13, 2 }
  0xc3   :  { %1284 = vst [vmem:[%s3482_s1 + $0xae8] sm:$0xff] %v371_v14  ;;  %v103_v14 = vld [vmem:[#allocation2 + $0x278] sm:$0xff] }
  0xc4   :  { %767 = vst [vmem:[%s3482_s1 + $0x2f0] sm:$0xff] %v373_v15 }
  0xc5   :  { %1285 = vst [vmem:[%s3482_s1 + $0xaf0] sm:$0xff] %v373_v15  ;;  %v2591_v15 = vld [vmem:[#allocation2 + $0x268] sm:$0xff] }
  0xc6   :  { %769 = vst [vmem:[%s3482_s1 + $0x300] sm:$0xff] %v72_v16  ;;  %v430_v41 = vrot.slane %v2591_v15, 2 }
  0xc7   :  { %1287 = vst [vmem:[%s3482_s1 + $0xb00] sm:$0xff] %v72_v16  ;;  %v406_v16 = vrot.slane %v89_v1, 2 }
  0xc8   :  { %770 = vst [vmem:[%s3482_s1 + $0x308] sm:$0xff] %v73_v17  ;;  %v431_v45 = vsel %vm280_vm0, %v428_v39, %v430_v41 }
  0xc9   :  { %1288 = vst [vmem:[%s3482_s1 + $0xb08] sm:$0xff] %v73_v17  ;;  %v2601_v17 = vld [vmem:[#allocation2 + $0x270] sm:$0xff] }
  0xca   :  { %771 = vst [vmem:[%s3482_s1 + $0x310] sm:$0xff] %v74_v18  ;;  %v432_v43 = vrot.slane %v2601_v17, 2 }
  0xcb   :  { %1289 = vst [vmem:[%s3482_s1 + $0xb10] sm:$0xff] %v74_v18  ;;  %v434_v18 = vrot.slane %v103_v14, 2 }
  0xcc   :  { %772 = vst [vmem:[%s3482_s1 + $0x318] sm:$0xff] %v75_v19 }
  0xcd   :  { %1290 = vst [vmem:[%s3482_s1 + $0xb18] sm:$0xff] %v75_v19  ;;  %v669_v19 = vsel %vm280_vm0, %v103_v14, %v405_v12  ;;  %v435_v47 = vsel %vm280_vm0, %v432_v43, %v434_v18 }
  0xce   :  { %773 = vst [vmem:[%s3482_s1 + $0x320] sm:$0xff] %v76_v20 }
  0xcf   :  { %1291 = vst [vmem:[%s3482_s1 + $0xb20] sm:$0xff] %v76_v20  ;;  %v408_v20 = vrot.slane %v90_v2, 2 }
  0xd0   :  { %774 = vst [vmem:[%s3482_s1 + $0x328] sm:$0xff] %v77_v21 }
  0xd1   :  { %1292 = vst [vmem:[%s3482_s1 + $0xb28] sm:$0xff] %v77_v21  ;;  %v410_v21 = vrot.slane %v91_v3, 2 }
  0xd2   :  { %775 = vst [vmem:[%s3482_s1 + $0x330] sm:$0xff] %v78_v22 }
  0xd3   :  { %1293 = vst [vmem:[%s3482_s1 + $0xb30] sm:$0xff] %v78_v22  ;;  %v407_v22 = vsel %vm280_vm0, %v405_v12, %v406_v16 }
  0xd4   :  { %776 = vst [vmem:[%s3482_s1 + $0x338] sm:$0xff] %v2283_v23 }
  0xd5   :  { %1294 = vst [vmem:[%s3482_s1 + $0xb38] sm:$0xff] %v2283_v23  ;;  %v412_v23 = vrot.slane %v92_v4, 2 }
  0xd6   :  { %777 = vst [vmem:[%s3482_s1 + $0x340] sm:$0xff] %v2293_v24 }
  0xd7   :  { %1295 = vst [vmem:[%s3482_s1 + $0xb40] sm:$0xff] %v2293_v24  ;;  %v409_v24 = vsel %vm280_vm0, %v406_v16, %v408_v20  ;;  %v413_v28 = vsel %vm280_vm0, %v410_v21, %v412_v23 }
  0xd8   :  { %778 = vst [vmem:[%s3482_s1 + $0x348] sm:$0xff] %v2303_v25 }
  0xd9   :  { %1296 = vst [vmem:[%s3482_s1 + $0xb48] sm:$0xff] %v2303_v25  ;;  %v414_v25 = vrot.slane %v93_v5, 2 }
  0xda   :  { %779 = vst [vmem:[%s3482_s1 + $0x350] sm:$0xff] %v2313_v26 }
  0xdb   :  { %1297 = vst [vmem:[%s3482_s1 + $0xb50] sm:$0xff] %v2313_v26  ;;  %v411_v26 = vsel %vm280_vm0, %v408_v20, %v410_v21  ;;  %v415_v30 = vsel %vm280_vm0, %v412_v23, %v414_v25  ;;  %v457_v21 = vrot.slane %v2819_v59, 2 }
  0xdc   :  { %780 = vst [vmem:[%s3482_s1 + $0x358] sm:$0xff] %v2323_v27 }
  0xdd   :  { %1298 = vst [vmem:[%s3482_s1 + $0xb58] sm:$0xff] %v2323_v27  ;;  %v416_v27 = vrot.slane %v94_v6, 2 }
  0xde   :  { %781 = vst [vmem:[%s3482_s1 + $0x360] sm:$0xff] %v2333_v29 }
  0xdf   :  { %1299 = vst [vmem:[%s3482_s1 + $0xb60] sm:$0xff] %v2333_v29  ;;  %v418_v29 = vrot.slane %v2531_v7, 2  ;;  %v417_v32 = vsel %vm280_vm0, %v414_v25, %v416_v27 }
  0xe0   :  { %782 = vst [vmem:[%s3482_s1 + $0x368] sm:$0xff] %v2343_v31 }
  0xe1   :  { %1300 = vst [vmem:[%s3482_s1 + $0xb68] sm:$0xff] %v2343_v31  ;;  %v420_v31 = vrot.slane %v2541_v8, 2 }
  0xe2   :  { %783 = vst [vmem:[%s3482_s1 + $0x370] sm:$0xff] %v2353_v33 }
  0xe3   :  { %1301 = vst [vmem:[%s3482_s1 + $0xb70] sm:$0xff] %v2353_v33  ;;  %v422_v33 = vrot.slane %v2551_v9, 2  ;;  %v421_v36 = vsel %vm280_vm0, %v418_v29, %v420_v31 }
  0xe4   :  { %784 = vst [vmem:[%s3482_s1 + $0x378] sm:$0xff] %v668_v35 }
  0xe5   :  { %800 = vst [vmem:[%s3482_s1 + $0x3f8] sm:$0x1f] %v403_v34 }
  0xe6   :  { %1302 = vst [vmem:[%s3482_s1 + $0xb78] sm:$0xff] %v668_v35  ;;  %v424_v35 = vrot.slane %v2561_v10, 2 }
  0xe7   :  { %1318 = vst [vmem:[%s3482_s1 + $0xbf8] sm:$0x1f] %v403_v34  ;;  %v419_v34 = vsel %vm280_vm0, %v416_v27, %v418_v29 }
  0xe8   :  { %785 = vst [vmem:[%s3482_s1 + $0x380] sm:$0xff] %v376_v38 }
  0xe9   :  { %1303 = vst [vmem:[%s3482_s1 + $0xb80] sm:$0xff] %v376_v38  ;;  %v423_v38 = vsel %vm280_vm0, %v420_v31, %v422_v33 }
  0xea   :  { %786 = vst [vmem:[%s3482_s1 + $0x388] sm:$0xff] %v378_v40 }
  0xeb   :  { %1304 = vst [vmem:[%s3482_s1 + $0xb88] sm:$0xff] %v378_v40  ;;  %v425_v40 = vsel %vm280_vm0, %v422_v33, %v424_v35  ;;  %v121_v33 = vld [vmem:[#allocation2 + $0x308] sm:$0xff] }
  0xec   :  { %787 = vst [vmem:[%s3482_s1 + $0x390] sm:$0xff] %v380_v42 }
  0xed   :  { %1305 = vst [vmem:[%s3482_s1 + $0xb90] sm:$0xff] %v380_v42  ;;  %v427_v42 = vsel %vm280_vm0, %v424_v35, %v426_v37  ;;  %v123_v35 = vld [vmem:[#allocation2 + $0x318] sm:$0xff] }
  0xee   :  { %788 = vst [vmem:[%s3482_s1 + $0x398] sm:$0xff] %v382_v44 }
  0xef   :  { %1306 = vst [vmem:[%s3482_s1 + $0xb98] sm:$0xff] %v382_v44  ;;  %v429_v44 = vsel %vm280_vm0, %v426_v37, %v428_v39  ;;  %v125_v37 = vld [vmem:[#allocation2 + $0x328] sm:$0xff]  ;;  %v3027_v39 = vld [vmem:[#allocation2 + $0x338] sm:$0xff] }
  0xf0   :  { %789 = vst [vmem:[%s3482_s1 + $0x3a0] sm:$0xff] %v384_v46 }
  0xf1   :  { %1307 = vst [vmem:[%s3482_s1 + $0xba0] sm:$0xff] %v384_v46  ;;  %v433_v46 = vsel %vm280_vm0, %v430_v41, %v432_v43  ;;  %v3047_v41 = vld [vmem:[#allocation2 + $0x348] sm:$0xff]  ;;  %v3067_v43 = vld [vmem:[#allocation2 + $0x358] sm:$0xff] }
  0xf2   :  { %790 = vst [vmem:[%s3482_s1 + $0x3a8] sm:$0xff] %v386_v48 }
  0xf3   :  { %1308 = vst [vmem:[%s3482_s1 + $0xba8] sm:$0xff] %v386_v48  ;;  %v104_v48 = vld [vmem:[#allocation2 + $0x280] sm:$0xff] }
  0xf4   :  { %791 = vst [vmem:[%s3482_s1 + $0x3b0] sm:$0xff] %v388_v50 }
  0xf5   :  { %1309 = vst [vmem:[%s3482_s1 + $0xbb0] sm:$0xff] %v388_v50  ;;  %v106_v50 = vld [vmem:[#allocation2 + $0x290] sm:$0xff] }
  0xf6   :  { %792 = vst [vmem:[%s3482_s1 + $0x3b8] sm:$0xff] %v390_v52 }
  0xf7   :  { %1310 = vst [vmem:[%s3482_s1 + $0xbb8] sm:$0xff] %v390_v52  ;;  %v108_v52 = vld [vmem:[#allocation2 + $0x2a0] sm:$0xff] }
  0xf8   :  { %793 = vst [vmem:[%s3482_s1 + $0x3c0] sm:$0xff] %v392_v54 }
  0xf9   :  { %1311 = vst [vmem:[%s3482_s1 + $0xbc0] sm:$0xff] %v392_v54  ;;  %v110_v54 = vld [vmem:[#allocation2 + $0x2b0] sm:$0xff] }
  0xfa   :  { %794 = vst [vmem:[%s3482_s1 + $0x3c8] sm:$0xff] %v394_v56 }
  0xfb   :  { %1312 = vst [vmem:[%s3482_s1 + $0xbc8] sm:$0xff] %v394_v56  ;;  %v2789_v56 = vld [vmem:[#allocation2 + $0x2c0] sm:$0xff] }
  0xfc   :  { %795 = vst [vmem:[%s3482_s1 + $0x3d0] sm:$0xff] %v396_v58 }
  0xfd   :  { %1313 = vst [vmem:[%s3482_s1 + $0xbd0] sm:$0xff] %v396_v58  ;;  %v2809_v58 = vld [vmem:[#allocation2 + $0x2d0] sm:$0xff] }
  0xfe   :  { %796 = vst [vmem:[%s3482_s1 + $0x3d8] sm:$0xff] %v398_v60 }
  0xff   :  { %1314 = vst [vmem:[%s3482_s1 + $0xbd8] sm:$0xff] %v398_v60  ;;  %v436_v60 = vrot.slane %v104_v48, 2 }
 0x100   :  { %797 = vst [vmem:[%s3482_s1 + $0x3e0] sm:$0xff] %v400_v61 }
 0x101   :  { %1315 = vst [vmem:[%s3482_s1 + $0xbe0] sm:$0xff] %v400_v61  ;;  %v2829_v61 = vld [vmem:[#allocation2 + $0x2e0] sm:$0xff] }
 0x102   :  { %798 = vst [vmem:[%s3482_s1 + $0x3e8] sm:$0xff] %v402_v62  ;;  %v459_v23 = vrot.slane %v2829_v61, 2 }
 0x103   :  { %1316 = vst [vmem:[%s3482_s1 + $0xbe8] sm:$0xff] %v402_v62  ;;  %v119_v62 = vld [vmem:[#allocation2 + $0x2f8] sm:$0xff] }
 0x104   :  { %799 = vst [vmem:[%s3482_s1 + $0x3f0] sm:$0xff] %v404_v63 }
 0x105   :  { %1317 = vst [vmem:[%s3482_s1 + $0xbf0] sm:$0xff] %v404_v63  ;;  %v2839_v63 = vld [vmem:[#allocation2 + $0x2e8] sm:$0xff] }
 0x106   :  { %801 = vst [vmem:[%s3482_s1 + $0x400] sm:$0xff] %v88_v0  ;;  %v461_v25 = vrot.slane %v2839_v63, 2 }
 0x107   :  { %1319 = vst [vmem:[%s3482_s1 + $0xc00] sm:$0xff] %v88_v0  ;;  %v437_v0 = vrot.slane %v105_v49, 2 }
 0x108   :  { %802 = vst [vmem:[%s3482_s1 + $0x408] sm:$0xff] %v89_v1  ;;  %v462_v29 = vsel %vm280_vm0, %v459_v23, %v461_v25 }
 0x109   :  { %1320 = vst [vmem:[%s3482_s1 + $0xc08] sm:$0xff] %v89_v1  ;;  %v2849_v1 = vld [vmem:[#allocation2 + $0x2f0] sm:$0xff] }
 0x10a   :  { %803 = vst [vmem:[%s3482_s1 + $0x410] sm:$0xff] %v90_v2  ;;  %v463_v27 = vrot.slane %v2849_v1, 2 }
 0x10b   :  { %1321 = vst [vmem:[%s3482_s1 + $0xc10] sm:$0xff] %v90_v2  ;;  %v465_v2 = vrot.slane %v119_v62, 2 }
 0x10c   :  { %804 = vst [vmem:[%s3482_s1 + $0x418] sm:$0xff] %v91_v3 }
 0x10d   :  { %1322 = vst [vmem:[%s3482_s1 + $0xc18] sm:$0xff] %v91_v3  ;;  %v670_v3 = vsel %vm280_vm0, %v119_v62, %v436_v60  ;;  %v466_v31 = vsel %vm280_vm0, %v463_v27, %v465_v2 }
 0x10e   :  { %805 = vst [vmem:[%s3482_s1 + $0x420] sm:$0xff] %v92_v4 }
 0x10f   :  { %1323 = vst [vmem:[%s3482_s1 + $0xc20] sm:$0xff] %v92_v4  ;;  %v439_v4 = vrot.slane %v106_v50, 2 }
 0x110   :  { %806 = vst [vmem:[%s3482_s1 + $0x428] sm:$0xff] %v93_v5 }
 0x111   :  { %1324 = vst [vmem:[%s3482_s1 + $0xc28] sm:$0xff] %v93_v5  ;;  %v441_v5 = vrot.slane %v107_v51, 2 }
 0x112   :  { %807 = vst [vmem:[%s3482_s1 + $0x430] sm:$0xff] %v94_v6 }
 0x113   :  { %1325 = vst [vmem:[%s3482_s1 + $0xc30] sm:$0xff] %v94_v6  ;;  %v438_v6 = vsel %vm280_vm0, %v436_v60, %v437_v0 }
 0x114   :  { %808 = vst [vmem:[%s3482_s1 + $0x438] sm:$0xff] %v2531_v7 }
 0x115   :  { %1326 = vst [vmem:[%s3482_s1 + $0xc38] sm:$0xff] %v2531_v7  ;;  %v443_v7 = vrot.slane %v108_v52, 2 }
 0x116   :  { %809 = vst [vmem:[%s3482_s1 + $0x440] sm:$0xff] %v2541_v8 }
 0x117   :  { %1327 = vst [vmem:[%s3482_s1 + $0xc40] sm:$0xff] %v2541_v8  ;;  %v440_v8 = vsel %vm280_vm0, %v437_v0, %v439_v4  ;;  %v444_v12 = vsel %vm280_vm0, %v441_v5, %v443_v7 }
 0x118   :  { %810 = vst [vmem:[%s3482_s1 + $0x448] sm:$0xff] %v2551_v9 }
 0x119   :  { %1328 = vst [vmem:[%s3482_s1 + $0xc48] sm:$0xff] %v2551_v9  ;;  %v445_v9 = vrot.slane %v109_v53, 2 }
 0x11a   :  { %811 = vst [vmem:[%s3482_s1 + $0x450] sm:$0xff] %v2561_v10 }
 0x11b   :  { %1329 = vst [vmem:[%s3482_s1 + $0xc50] sm:$0xff] %v2561_v10  ;;  %v442_v10 = vsel %vm280_vm0, %v439_v4, %v441_v5  ;;  %v446_v14 = vsel %vm280_vm0, %v443_v7, %v445_v9  ;;  %v488_v5 = vrot.slane %v3067_v43, 2 }
 0x11c   :  { %812 = vst [vmem:[%s3482_s1 + $0x458] sm:$0xff] %v2571_v11 }
 0x11d   :  { %1330 = vst [vmem:[%s3482_s1 + $0xc58] sm:$0xff] %v2571_v11  ;;  %v447_v11 = vrot.slane %v110_v54, 2 }
 0x11e   :  { %813 = vst [vmem:[%s3482_s1 + $0x460] sm:$0xff] %v2581_v13 }
 0x11f   :  { %1331 = vst [vmem:[%s3482_s1 + $0xc60] sm:$0xff] %v2581_v13  ;;  %v449_v13 = vrot.slane %v2779_v55, 2  ;;  %v448_v16 = vsel %vm280_vm0, %v445_v9, %v447_v11 }
 0x120   :  { %814 = vst [vmem:[%s3482_s1 + $0x468] sm:$0xff] %v2591_v15 }
 0x121   :  { %1332 = vst [vmem:[%s3482_s1 + $0xc68] sm:$0xff] %v2591_v15  ;;  %v451_v15 = vrot.slane %v2789_v56, 2 }
 0x122   :  { %815 = vst [vmem:[%s3482_s1 + $0x470] sm:$0xff] %v2601_v17 }
 0x123   :  { %1333 = vst [vmem:[%s3482_s1 + $0xc70] sm:$0xff] %v2601_v17  ;;  %v453_v17 = vrot.slane %v2799_v57, 2  ;;  %v452_v20 = vsel %vm280_vm0, %v449_v13, %v451_v15 }
 0x124   :  { %816 = vst [vmem:[%s3482_s1 + $0x478] sm:$0xff] %v669_v19 }
 0x125   :  { %832 = vst [vmem:[%s3482_s1 + $0x4f8] sm:$0x1f] %v434_v18 }
 0x126   :  { %1334 = vst [vmem:[%s3482_s1 + $0xc78] sm:$0xff] %v669_v19  ;;  %v455_v19 = vrot.slane %v2809_v58, 2 }
 0x127   :  { %1350 = vst [vmem:[%s3482_s1 + $0xcf8] sm:$0x1f] %v434_v18  ;;  %v450_v18 = vsel %vm280_vm0, %v447_v11, %v449_v13 }
 0x128   :  { %817 = vst [vmem:[%s3482_s1 + $0x480] sm:$0xff] %v407_v22 }
 0x129   :  { %1335 = vst [vmem:[%s3482_s1 + $0xc80] sm:$0xff] %v407_v22  ;;  %v454_v22 = vsel %vm280_vm0, %v451_v15, %v453_v17 }
 0x12a   :  { %818 = vst [vmem:[%s3482_s1 + $0x488] sm:$0xff] %v409_v24 }
 0x12b   :  { %1336 = vst [vmem:[%s3482_s1 + $0xc88] sm:$0xff] %v409_v24  ;;  %v456_v24 = vsel %vm280_vm0, %v453_v17, %v455_v19  ;;  %v137_v17 = vld [vmem:[#allocation2 + $0x388] sm:$0xff] }
 0x12c   :  { %819 = vst [vmem:[%s3482_s1 + $0x490] sm:$0xff] %v411_v26 }
 0x12d   :  { %1337 = vst [vmem:[%s3482_s1 + $0xc90] sm:$0xff] %v411_v26  ;;  %v458_v26 = vsel %vm280_vm0, %v455_v19, %v457_v21  ;;  %v139_v19 = vld [vmem:[#allocation2 + $0x398] sm:$0xff] }
 0x12e   :  { %820 = vst [vmem:[%s3482_s1 + $0x498] sm:$0xff] %v413_v28 }
 0x12f   :  { %1338 = vst [vmem:[%s3482_s1 + $0xc98] sm:$0xff] %v413_v28  ;;  %v460_v28 = vsel %vm280_vm0, %v457_v21, %v459_v23  ;;  %v141_v21 = vld [vmem:[#allocation2 + $0x3a8] sm:$0xff]  ;;  %v3275_v23 = vld [vmem:[#allocation2 + $0x3b8] sm:$0xff] }
 0x130   :  { %821 = vst [vmem:[%s3482_s1 + $0x4a0] sm:$0xff] %v415_v30 }
 0x131   :  { %1339 = vst [vmem:[%s3482_s1 + $0xca0] sm:$0xff] %v415_v30  ;;  %v464_v30 = vsel %vm280_vm0, %v461_v25, %v463_v27  ;;  %v3295_v25 = vld [vmem:[#allocation2 + $0x3c8] sm:$0xff]  ;;  %v3315_v27 = vld [vmem:[#allocation2 + $0x3d8] sm:$0xff] }
 0x132   :  { %822 = vst [vmem:[%s3482_s1 + $0x4a8] sm:$0xff] %v417_v32 }
 0x133   :  { %1340 = vst [vmem:[%s3482_s1 + $0xca8] sm:$0xff] %v417_v32  ;;  %v120_v32 = vld [vmem:[#allocation2 + $0x300] sm:$0xff] }
 0x134   :  { %823 = vst [vmem:[%s3482_s1 + $0x4b0] sm:$0xff] %v419_v34 }
 0x135   :  { %1341 = vst [vmem:[%s3482_s1 + $0xcb0] sm:$0xff] %v419_v34  ;;  %v122_v34 = vld [vmem:[#allocation2 + $0x310] sm:$0xff] }
 0x136   :  { %824 = vst [vmem:[%s3482_s1 + $0x4b8] sm:$0xff] %v421_v36 }
 0x137   :  { %1342 = vst [vmem:[%s3482_s1 + $0xcb8] sm:$0xff] %v421_v36  ;;  %v124_v36 = vld [vmem:[#allocation2 + $0x320] sm:$0xff] }
 0x138   :  { %825 = vst [vmem:[%s3482_s1 + $0x4c0] sm:$0xff] %v423_v38 }
 0x139   :  { %1343 = vst [vmem:[%s3482_s1 + $0xcc0] sm:$0xff] %v423_v38  ;;  %v126_v38 = vld [vmem:[#allocation2 + $0x330] sm:$0xff] }
 0x13a   :  { %826 = vst [vmem:[%s3482_s1 + $0x4c8] sm:$0xff] %v425_v40 }
 0x13b   :  { %1344 = vst [vmem:[%s3482_s1 + $0xcc8] sm:$0xff] %v425_v40  ;;  %v3037_v40 = vld [vmem:[#allocation2 + $0x340] sm:$0xff] }
 0x13c   :  { %827 = vst [vmem:[%s3482_s1 + $0x4d0] sm:$0xff] %v427_v42 }
 0x13d   :  { %1345 = vst [vmem:[%s3482_s1 + $0xcd0] sm:$0xff] %v427_v42  ;;  %v3057_v42 = vld [vmem:[#allocation2 + $0x350] sm:$0xff] }
 0x13e   :  { %828 = vst [vmem:[%s3482_s1 + $0x4d8] sm:$0xff] %v429_v44 }
 0x13f   :  { %1346 = vst [vmem:[%s3482_s1 + $0xcd8] sm:$0xff] %v429_v44  ;;  %v467_v44 = vrot.slane %v120_v32, 2 }
 0x140   :  { %829 = vst [vmem:[%s3482_s1 + $0x4e0] sm:$0xff] %v431_v45 }
 0x141   :  { %1347 = vst [vmem:[%s3482_s1 + $0xce0] sm:$0xff] %v431_v45  ;;  %v3077_v45 = vld [vmem:[#allocation2 + $0x360] sm:$0xff] }
 0x142   :  { %830 = vst [vmem:[%s3482_s1 + $0x4e8] sm:$0xff] %v433_v46  ;;  %v490_v7 = vrot.slane %v3077_v45, 2 }
 0x143   :  { %1348 = vst [vmem:[%s3482_s1 + $0xce8] sm:$0xff] %v433_v46  ;;  %v135_v46 = vld [vmem:[#allocation2 + $0x378] sm:$0xff] }
 0x144   :  { %831 = vst [vmem:[%s3482_s1 + $0x4f0] sm:$0xff] %v435_v47 }
 0x145   :  { %1349 = vst [vmem:[%s3482_s1 + $0xcf0] sm:$0xff] %v435_v47  ;;  %v3087_v47 = vld [vmem:[#allocation2 + $0x368] sm:$0xff] }
 0x146   :  { %833 = vst [vmem:[%s3482_s1 + $0x500] sm:$0xff] %v104_v48  ;;  %v492_v9 = vrot.slane %v3087_v47, 2 }
 0x147   :  { %1351 = vst [vmem:[%s3482_s1 + $0xd00] sm:$0xff] %v104_v48  ;;  %v468_v48 = vrot.slane %v121_v33, 2 }
 0x148   :  { %834 = vst [vmem:[%s3482_s1 + $0x508] sm:$0xff] %v105_v49  ;;  %v493_v13 = vsel %vm280_vm0, %v490_v7, %v492_v9 }
 0x149   :  { %1352 = vst [vmem:[%s3482_s1 + $0xd08] sm:$0xff] %v105_v49  ;;  %v3097_v49 = vld [vmem:[#allocation2 + $0x370] sm:$0xff] }
 0x14a   :  { %835 = vst [vmem:[%s3482_s1 + $0x510] sm:$0xff] %v106_v50  ;;  %v494_v11 = vrot.slane %v3097_v49, 2 }
 0x14b   :  { %1353 = vst [vmem:[%s3482_s1 + $0xd10] sm:$0xff] %v106_v50  ;;  %v496_v50 = vrot.slane %v135_v46, 2 }
 0x14c   :  { %836 = vst [vmem:[%s3482_s1 + $0x518] sm:$0xff] %v107_v51 }
 0x14d   :  { %1354 = vst [vmem:[%s3482_s1 + $0xd18] sm:$0xff] %v107_v51  ;;  %v671_v51 = vsel %vm280_vm0, %v135_v46, %v467_v44  ;;  %v497_v15 = vsel %vm280_vm0, %v494_v11, %v496_v50 }
 0x14e   :  { %837 = vst [vmem:[%s3482_s1 + $0x520] sm:$0xff] %v108_v52 }
 0x14f   :  { %1355 = vst [vmem:[%s3482_s1 + $0xd20] sm:$0xff] %v108_v52  ;;  %v470_v52 = vrot.slane %v122_v34, 2 }
 0x150   :  { %838 = vst [vmem:[%s3482_s1 + $0x528] sm:$0xff] %v109_v53 }
 0x151   :  { %1356 = vst [vmem:[%s3482_s1 + $0xd28] sm:$0xff] %v109_v53  ;;  %v472_v53 = vrot.slane %v123_v35, 2 }
 0x152   :  { %839 = vst [vmem:[%s3482_s1 + $0x530] sm:$0xff] %v110_v54 }
 0x153   :  { %1357 = vst [vmem:[%s3482_s1 + $0xd30] sm:$0xff] %v110_v54  ;;  %v469_v54 = vsel %vm280_vm0, %v467_v44, %v468_v48 }
 0x154   :  { %840 = vst [vmem:[%s3482_s1 + $0x538] sm:$0xff] %v2779_v55 }
 0x155   :  { %1358 = vst [vmem:[%s3482_s1 + $0xd38] sm:$0xff] %v2779_v55  ;;  %v474_v55 = vrot.slane %v124_v36, 2 }
 0x156   :  { %841 = vst [vmem:[%s3482_s1 + $0x540] sm:$0xff] %v2789_v56 }
 0x157   :  { %1359 = vst [vmem:[%s3482_s1 + $0xd40] sm:$0xff] %v2789_v56  ;;  %v471_v56 = vsel %vm280_vm0, %v468_v48, %v470_v52  ;;  %v475_v60 = vsel %vm280_vm0, %v472_v53, %v474_v55 }
 0x158   :  { %842 = vst [vmem:[%s3482_s1 + $0x548] sm:$0xff] %v2799_v57 }
 0x159   :  { %1360 = vst [vmem:[%s3482_s1 + $0xd48] sm:$0xff] %v2799_v57  ;;  %v476_v57 = vrot.slane %v125_v37, 2 }
 0x15a   :  { %843 = vst [vmem:[%s3482_s1 + $0x550] sm:$0xff] %v2809_v58 }
 0x15b   :  { %1361 = vst [vmem:[%s3482_s1 + $0xd50] sm:$0xff] %v2809_v58  ;;  %v473_v58 = vsel %vm280_vm0, %v470_v52, %v472_v53  ;;  %v477_v62 = vsel %vm280_vm0, %v474_v55, %v476_v57  ;;  %v519_v53 = vrot.slane %v3315_v27, 2 }
 0x15c   :  { %844 = vst [vmem:[%s3482_s1 + $0x558] sm:$0xff] %v2819_v59 }
 0x15d   :  { %1362 = vst [vmem:[%s3482_s1 + $0xd58] sm:$0xff] %v2819_v59  ;;  %v478_v59 = vrot.slane %v126_v38, 2 }
 0x15e   :  { %845 = vst [vmem:[%s3482_s1 + $0x560] sm:$0xff] %v2829_v61 }
 0x15f   :  { %1363 = vst [vmem:[%s3482_s1 + $0xd60] sm:$0xff] %v2829_v61  ;;  %v480_v61 = vrot.slane %v3027_v39, 2  ;;  %v479_v0 = vsel %vm280_vm0, %v476_v57, %v478_v59 }
 0x160   :  { %846 = vst [vmem:[%s3482_s1 + $0x568] sm:$0xff] %v2839_v63 }
 0x161   :  { %1364 = vst [vmem:[%s3482_s1 + $0xd68] sm:$0xff] %v2839_v63  ;;  %v482_v63 = vrot.slane %v3037_v40, 2 }
 0x162   :  { %847 = vst [vmem:[%s3482_s1 + $0x570] sm:$0xff] %v2849_v1 }
 0x163   :  { %1365 = vst [vmem:[%s3482_s1 + $0xd70] sm:$0xff] %v2849_v1  ;;  %v484_v1 = vrot.slane %v3047_v41, 2  ;;  %v483_v4 = vsel %vm280_vm0, %v480_v61, %v482_v63 }
 0x164   :  { %848 = vst [vmem:[%s3482_s1 + $0x578] sm:$0xff] %v670_v3 }
 0x165   :  { %864 = vst [vmem:[%s3482_s1 + $0x5f8] sm:$0x1f] %v465_v2 }
 0x166   :  { %1366 = vst [vmem:[%s3482_s1 + $0xd78] sm:$0xff] %v670_v3  ;;  %v486_v3 = vrot.slane %v3057_v42, 2 }
 0x167   :  { %1382 = vst [vmem:[%s3482_s1 + $0xdf8] sm:$0x1f] %v465_v2  ;;  %v481_v2 = vsel %vm280_vm0, %v478_v59, %v480_v61 }
 0x168   :  { %849 = vst [vmem:[%s3482_s1 + $0x580] sm:$0xff] %v438_v6 }
 0x169   :  { %1367 = vst [vmem:[%s3482_s1 + $0xd80] sm:$0xff] %v438_v6  ;;  %v485_v6 = vsel %vm280_vm0, %v482_v63, %v484_v1 }
 0x16a   :  { %850 = vst [vmem:[%s3482_s1 + $0x588] sm:$0xff] %v440_v8 }
 0x16b   :  { %1368 = vst [vmem:[%s3482_s1 + $0xd88] sm:$0xff] %v440_v8  ;;  %v487_v8 = vsel %vm280_vm0, %v484_v1, %v486_v3 }
 0x16c   :  { %851 = vst [vmem:[%s3482_s1 + $0x590] sm:$0xff] %v442_v10 }
 0x16d   :  { %1369 = vst [vmem:[%s3482_s1 + $0xd90] sm:$0xff] %v442_v10  ;;  %v489_v10 = vsel %vm280_vm0, %v486_v3, %v488_v5 }
 0x16e   :  { %852 = vst [vmem:[%s3482_s1 + $0x598] sm:$0xff] %v444_v12 }
 0x16f   :  { %1370 = vst [vmem:[%s3482_s1 + $0xd98] sm:$0xff] %v444_v12  ;;  %v491_v12 = vsel %vm280_vm0, %v488_v5, %v490_v7 }
 0x170   :  { %853 = vst [vmem:[%s3482_s1 + $0x5a0] sm:$0xff] %v446_v14 }
 0x171   :  { %1371 = vst [vmem:[%s3482_s1 + $0xda0] sm:$0xff] %v446_v14  ;;  %v495_v14 = vsel %vm280_vm0, %v492_v9, %v494_v11 }
 0x172   :  { %854 = vst [vmem:[%s3482_s1 + $0x5a8] sm:$0xff] %v448_v16 }
 0x173   :  { %1372 = vst [vmem:[%s3482_s1 + $0xda8] sm:$0xff] %v448_v16  ;;  %v136_v16 = vld [vmem:[#allocation2 + $0x380] sm:$0xff] }
 0x174   :  { %855 = vst [vmem:[%s3482_s1 + $0x5b0] sm:$0xff] %v450_v18 }
 0x175   :  { %1373 = vst [vmem:[%s3482_s1 + $0xdb0] sm:$0xff] %v450_v18  ;;  %v138_v18 = vld [vmem:[#allocation2 + $0x390] sm:$0xff] }
 0x176   :  { %856 = vst [vmem:[%s3482_s1 + $0x5b8] sm:$0xff] %v452_v20 }
 0x177   :  { %1374 = vst [vmem:[%s3482_s1 + $0xdb8] sm:$0xff] %v452_v20  ;;  %v140_v20 = vld [vmem:[#allocation2 + $0x3a0] sm:$0xff] }
 0x178   :  { %857 = vst [vmem:[%s3482_s1 + $0x5c0] sm:$0xff] %v454_v22 }
 0x179   :  { %1375 = vst [vmem:[%s3482_s1 + $0xdc0] sm:$0xff] %v454_v22  ;;  %v142_v22 = vld [vmem:[#allocation2 + $0x3b0] sm:$0xff] }
 0x17a   :  { %858 = vst [vmem:[%s3482_s1 + $0x5c8] sm:$0xff] %v456_v24 }
 0x17b   :  { %1376 = vst [vmem:[%s3482_s1 + $0xdc8] sm:$0xff] %v456_v24  ;;  %v3285_v24 = vld [vmem:[#allocation2 + $0x3c0] sm:$0xff] }
 0x17c   :  { %859 = vst [vmem:[%s3482_s1 + $0x5d0] sm:$0xff] %v458_v26 }
 0x17d   :  { %1377 = vst [vmem:[%s3482_s1 + $0xdd0] sm:$0xff] %v458_v26  ;;  %v3305_v26 = vld [vmem:[#allocation2 + $0x3d0] sm:$0xff] }
 0x17e   :  { %860 = vst [vmem:[%s3482_s1 + $0x5d8] sm:$0xff] %v460_v28 }
 0x17f   :  { %1378 = vst [vmem:[%s3482_s1 + $0xdd8] sm:$0xff] %v460_v28  ;;  %v498_v28 = vrot.slane %v136_v16, 2 }
 0x180   :  { %861 = vst [vmem:[%s3482_s1 + $0x5e0] sm:$0xff] %v462_v29 }
 0x181   :  { %1379 = vst [vmem:[%s3482_s1 + $0xde0] sm:$0xff] %v462_v29  ;;  %v3325_v29 = vld [vmem:[#allocation2 + $0x3e0] sm:$0xff] }
 0x182   :  { %862 = vst [vmem:[%s3482_s1 + $0x5e8] sm:$0xff] %v464_v30  ;;  %v521_v55 = vrot.slane %v3325_v29, 2 }
 0x183   :  { %1380 = vst [vmem:[%s3482_s1 + $0xde8] sm:$0xff] %v464_v30  ;;  %v151_v30 = vld [vmem:[#allocation2 + $0x3f8] sm:$0xff] }
 0x184   :  { %863 = vst [vmem:[%s3482_s1 + $0x5f0] sm:$0xff] %v466_v31 }
 0x185   :  { %1381 = vst [vmem:[%s3482_s1 + $0xdf0] sm:$0xff] %v466_v31  ;;  %v3335_v31 = vld [vmem:[#allocation2 + $0x3e8] sm:$0xff] }
 0x186   :  { %865 = vst [vmem:[%s3482_s1 + $0x600] sm:$0xff] %v120_v32  ;;  %v523_v57 = vrot.slane %v3335_v31, 2 }
 0x187   :  { %1383 = vst [vmem:[%s3482_s1 + $0xe00] sm:$0xff] %v120_v32  ;;  %v499_v32 = vrot.slane %v137_v17, 2 }
 0x188   :  { %866 = vst [vmem:[%s3482_s1 + $0x608] sm:$0xff] %v121_v33  ;;  %v524_v61 = vsel %vm280_vm0, %v521_v55, %v523_v57 }
 0x189   :  { %1384 = vst [vmem:[%s3482_s1 + $0xe08] sm:$0xff] %v121_v33  ;;  %v3345_v33 = vld [vmem:[#allocation2 + $0x3f0] sm:$0xff] }
 0x18a   :  { %867 = vst [vmem:[%s3482_s1 + $0x610] sm:$0xff] %v122_v34  ;;  %v525_v59 = vrot.slane %v3345_v33, 2 }
 0x18b   :  { %1385 = vst [vmem:[%s3482_s1 + $0xe10] sm:$0xff] %v122_v34  ;;  %v527_v34 = vrot.slane %v151_v30, 2 }
 0x18c   :  { %868 = vst [vmem:[%s3482_s1 + $0x618] sm:$0xff] %v123_v35 }
 0x18d   :  { %1386 = vst [vmem:[%s3482_s1 + $0xe18] sm:$0xff] %v123_v35  ;;  %v672_v35 = vsel %vm280_vm0, %v151_v30, %v498_v28  ;;  %v528_v63 = vsel %vm280_vm0, %v525_v59, %v527_v34 }
 0x18e   :  { %869 = vst [vmem:[%s3482_s1 + $0x620] sm:$0xff] %v124_v36 }
 0x18f   :  { %1387 = vst [vmem:[%s3482_s1 + $0xe20] sm:$0xff] %v124_v36  ;;  %v501_v36 = vrot.slane %v138_v18, 2 }
 0x190   :  { %870 = vst [vmem:[%s3482_s1 + $0x628] sm:$0xff] %v125_v37 }
 0x191   :  { %1388 = vst [vmem:[%s3482_s1 + $0xe28] sm:$0xff] %v125_v37  ;;  %v503_v37 = vrot.slane %v139_v19, 2 }
 0x192   :  { %871 = vst [vmem:[%s3482_s1 + $0x630] sm:$0xff] %v126_v38 }
 0x193   :  { %1389 = vst [vmem:[%s3482_s1 + $0xe30] sm:$0xff] %v126_v38  ;;  %v500_v38 = vsel %vm280_vm0, %v498_v28, %v499_v32 }
 0x194   :  { %872 = vst [vmem:[%s3482_s1 + $0x638] sm:$0xff] %v3027_v39 }
 0x195   :  { %1390 = vst [vmem:[%s3482_s1 + $0xe38] sm:$0xff] %v3027_v39  ;;  %v505_v39 = vrot.slane %v140_v20, 2 }
 0x196   :  { %873 = vst [vmem:[%s3482_s1 + $0x640] sm:$0xff] %v3037_v40 }
 0x197   :  { %1391 = vst [vmem:[%s3482_s1 + $0xe40] sm:$0xff] %v3037_v40  ;;  %v502_v40 = vsel %vm280_vm0, %v499_v32, %v501_v36  ;;  %v506_v44 = vsel %vm280_vm0, %v503_v37, %v505_v39 }
 0x198   :  { %874 = vst [vmem:[%s3482_s1 + $0x648] sm:$0xff] %v3047_v41 }
 0x199   :  { %1392 = vst [vmem:[%s3482_s1 + $0xe48] sm:$0xff] %v3047_v41  ;;  %v507_v41 = vrot.slane %v141_v21, 2 }
 0x19a   :  { %875 = vst [vmem:[%s3482_s1 + $0x650] sm:$0xff] %v3057_v42 }
 0x19b   :  { %1393 = vst [vmem:[%s3482_s1 + $0xe50] sm:$0xff] %v3057_v42  ;;  %v504_v42 = vsel %vm280_vm0, %v501_v36, %v503_v37  ;;  %v508_v46 = vsel %vm280_vm0, %v505_v39, %v507_v41 }
 0x19c   :  { %876 = vst [vmem:[%s3482_s1 + $0x658] sm:$0xff] %v3067_v43 }
 0x19d   :  { %1394 = vst [vmem:[%s3482_s1 + $0xe58] sm:$0xff] %v3067_v43  ;;  %v509_v43 = vrot.slane %v142_v22, 2 }
 0x19e   :  { %877 = vst [vmem:[%s3482_s1 + $0x660] sm:$0xff] %v3077_v45 }
 0x19f   :  { %1395 = vst [vmem:[%s3482_s1 + $0xe60] sm:$0xff] %v3077_v45  ;;  %v511_v45 = vrot.slane %v3275_v23, 2  ;;  %v510_v48 = vsel %vm280_vm0, %v507_v41, %v509_v43 }
 0x1a0   :  { %878 = vst [vmem:[%s3482_s1 + $0x668] sm:$0xff] %v3087_v47 }
 0x1a1   :  { %1396 = vst [vmem:[%s3482_s1 + $0xe68] sm:$0xff] %v3087_v47  ;;  %v513_v47 = vrot.slane %v3285_v24, 2 }
 0x1a2   :  { %879 = vst [vmem:[%s3482_s1 + $0x670] sm:$0xff] %v3097_v49 }
 0x1a3   :  { %1397 = vst [vmem:[%s3482_s1 + $0xe70] sm:$0xff] %v3097_v49  ;;  %v515_v49 = vrot.slane %v3295_v25, 2  ;;  %v514_v52 = vsel %vm280_vm0, %v511_v45, %v513_v47 }
 0x1a4   :  { %880 = vst [vmem:[%s3482_s1 + $0x678] sm:$0xff] %v671_v51 }
 0x1a5   :  { %896 = vst [vmem:[%s3482_s1 + $0x6f8] sm:$0x1f] %v496_v50 }
 0x1a6   :  { %1398 = vst [vmem:[%s3482_s1 + $0xe78] sm:$0xff] %v671_v51  ;;  %v517_v51 = vrot.slane %v3305_v26, 2 }
 0x1a7   :  { %1414 = vst [vmem:[%s3482_s1 + $0xef8] sm:$0x1f] %v496_v50  ;;  %v512_v50 = vsel %vm280_vm0, %v509_v43, %v511_v45 }
 0x1a8   :  { %881 = vst [vmem:[%s3482_s1 + $0x680] sm:$0xff] %v469_v54 }
 0x1a9   :  { %1399 = vst [vmem:[%s3482_s1 + $0xe80] sm:$0xff] %v469_v54  ;;  %v516_v54 = vsel %vm280_vm0, %v513_v47, %v515_v49 }
 0x1aa   :  { %882 = vst [vmem:[%s3482_s1 + $0x688] sm:$0xff] %v471_v56 }
 0x1ab   :  { %1400 = vst [vmem:[%s3482_s1 + $0xe88] sm:$0xff] %v471_v56  ;;  %v518_v56 = vsel %vm280_vm0, %v515_v49, %v517_v51 }
 0x1ac   :  { %883 = vst [vmem:[%s3482_s1 + $0x690] sm:$0xff] %v473_v58 }
 0x1ad   :  { %1401 = vst [vmem:[%s3482_s1 + $0xe90] sm:$0xff] %v473_v58  ;;  %v520_v58 = vsel %vm280_vm0, %v517_v51, %v519_v53 }
 0x1ae   :  { %884 = vst [vmem:[%s3482_s1 + $0x698] sm:$0xff] %v475_v60 }
 0x1af   :  { %1402 = vst [vmem:[%s3482_s1 + $0xe98] sm:$0xff] %v475_v60  ;;  %v522_v60 = vsel %vm280_vm0, %v519_v53, %v521_v55 }
 0x1b0   :  { %885 = vst [vmem:[%s3482_s1 + $0x6a0] sm:$0xff] %v477_v62 }
 0x1b1   :  { %1403 = vst [vmem:[%s3482_s1 + $0xea0] sm:$0xff] %v477_v62  ;;  %v526_v62 = vsel %vm280_vm0, %v523_v57, %v525_v59 }
 0x1b2   :  { %886 = vst [vmem:[%s3482_s1 + $0x6a8] sm:$0xff] %v479_v0 }
 0x1b3   :  { %1404 = vst [vmem:[%s3482_s1 + $0xea8] sm:$0xff] %v479_v0 }
 0x1b4   :  { %887 = vst [vmem:[%s3482_s1 + $0x6b0] sm:$0xff] %v481_v2 }
 0x1b5   :  { %1405 = vst [vmem:[%s3482_s1 + $0xeb0] sm:$0xff] %v481_v2 }
 0x1b6   :  { %888 = vst [vmem:[%s3482_s1 + $0x6b8] sm:$0xff] %v483_v4 }
 0x1b7   :  { %1406 = vst [vmem:[%s3482_s1 + $0xeb8] sm:$0xff] %v483_v4 }
 0x1b8   :  { %889 = vst [vmem:[%s3482_s1 + $0x6c0] sm:$0xff] %v485_v6 }
 0x1b9   :  { %1407 = vst [vmem:[%s3482_s1 + $0xec0] sm:$0xff] %v485_v6 }
 0x1ba   :  { %890 = vst [vmem:[%s3482_s1 + $0x6c8] sm:$0xff] %v487_v8 }
 0x1bb   :  { %1408 = vst [vmem:[%s3482_s1 + $0xec8] sm:$0xff] %v487_v8 }
 0x1bc   :  { %891 = vst [vmem:[%s3482_s1 + $0x6d0] sm:$0xff] %v489_v10 }
 0x1bd   :  { %1409 = vst [vmem:[%s3482_s1 + $0xed0] sm:$0xff] %v489_v10 }
 0x1be   :  { %892 = vst [vmem:[%s3482_s1 + $0x6d8] sm:$0xff] %v491_v12 }
 0x1bf   :  { %1410 = vst [vmem:[%s3482_s1 + $0xed8] sm:$0xff] %v491_v12 }
 0x1c0   :  { %893 = vst [vmem:[%s3482_s1 + $0x6e0] sm:$0xff] %v493_v13 }
 0x1c1   :  { %1411 = vst [vmem:[%s3482_s1 + $0xee0] sm:$0xff] %v493_v13 }
 0x1c2   :  { %894 = vst [vmem:[%s3482_s1 + $0x6e8] sm:$0xff] %v495_v14 }
 0x1c3   :  { %1412 = vst [vmem:[%s3482_s1 + $0xee8] sm:$0xff] %v495_v14 }
 0x1c4   :  { %895 = vst [vmem:[%s3482_s1 + $0x6f0] sm:$0xff] %v497_v15 }
 0x1c5   :  { %1413 = vst [vmem:[%s3482_s1 + $0xef0] sm:$0xff] %v497_v15 }
 0x1c6   :  { %897 = vst [vmem:[%s3482_s1 + $0x700] sm:$0xff] %v136_v16 }
 0x1c7   :  { %1415 = vst [vmem:[%s3482_s1 + $0xf00] sm:$0xff] %v136_v16 }
 0x1c8   :  { %898 = vst [vmem:[%s3482_s1 + $0x708] sm:$0xff] %v137_v17 }
 0x1c9   :  { %1416 = vst [vmem:[%s3482_s1 + $0xf08] sm:$0xff] %v137_v17 }
 0x1ca   :  { %899 = vst [vmem:[%s3482_s1 + $0x710] sm:$0xff] %v138_v18 }
 0x1cb   :  { %1417 = vst [vmem:[%s3482_s1 + $0xf10] sm:$0xff] %v138_v18 }
 0x1cc   :  { %900 = vst [vmem:[%s3482_s1 + $0x718] sm:$0xff] %v139_v19 }
 0x1cd   :  { %1418 = vst [vmem:[%s3482_s1 + $0xf18] sm:$0xff] %v139_v19 }
 0x1ce   :  { %901 = vst [vmem:[%s3482_s1 + $0x720] sm:$0xff] %v140_v20 }
 0x1cf   :  { %1419 = vst [vmem:[%s3482_s1 + $0xf20] sm:$0xff] %v140_v20 }
 0x1d0   :  { %902 = vst [vmem:[%s3482_s1 + $0x728] sm:$0xff] %v141_v21 }
 0x1d1   :  { %1420 = vst [vmem:[%s3482_s1 + $0xf28] sm:$0xff] %v141_v21 }
 0x1d2   :  { %903 = vst [vmem:[%s3482_s1 + $0x730] sm:$0xff] %v142_v22 }
 0x1d3   :  { %1421 = vst [vmem:[%s3482_s1 + $0xf30] sm:$0xff] %v142_v22 }
 0x1d4   :  { %904 = vst [vmem:[%s3482_s1 + $0x738] sm:$0xff] %v3275_v23 }
 0x1d5   :  { %1422 = vst [vmem:[%s3482_s1 + $0xf38] sm:$0xff] %v3275_v23 }
 0x1d6   :  { %905 = vst [vmem:[%s3482_s1 + $0x740] sm:$0xff] %v3285_v24 }
 0x1d7   :  { %1423 = vst [vmem:[%s3482_s1 + $0xf40] sm:$0xff] %v3285_v24 }
 0x1d8   :  { %906 = vst [vmem:[%s3482_s1 + $0x748] sm:$0xff] %v3295_v25 }
 0x1d9   :  { %1424 = vst [vmem:[%s3482_s1 + $0xf48] sm:$0xff] %v3295_v25 }
 0x1da   :  { %907 = vst [vmem:[%s3482_s1 + $0x750] sm:$0xff] %v3305_v26 }
 0x1db   :  { %1425 = vst [vmem:[%s3482_s1 + $0xf50] sm:$0xff] %v3305_v26 }
 0x1dc   :  { %908 = vst [vmem:[%s3482_s1 + $0x758] sm:$0xff] %v3315_v27 }
 0x1dd   :  { %1426 = vst [vmem:[%s3482_s1 + $0xf58] sm:$0xff] %v3315_v27 }
 0x1de   :  { %909 = vst [vmem:[%s3482_s1 + $0x760] sm:$0xff] %v3325_v29 }
 0x1df   :  { %1427 = vst [vmem:[%s3482_s1 + $0xf60] sm:$0xff] %v3325_v29 }
 0x1e0   :  { %910 = vst [vmem:[%s3482_s1 + $0x768] sm:$0xff] %v3335_v31 }
 0x1e1   :  { %1428 = vst [vmem:[%s3482_s1 + $0xf68] sm:$0xff] %v3335_v31 }
 0x1e2   :  { %911 = vst [vmem:[%s3482_s1 + $0x770] sm:$0xff] %v3345_v33 }
 0x1e3   :  { %1429 = vst [vmem:[%s3482_s1 + $0xf70] sm:$0xff] %v3345_v33 }
 0x1e4   :  { %912 = vst [vmem:[%s3482_s1 + $0x778] sm:$0xff] %v672_v35 }
 0x1e5   :  { %928 = vst [vmem:[%s3482_s1 + $0x7f8] sm:$0x1f] %v527_v34 }
 0x1e6   :  { %1430 = vst [vmem:[%s3482_s1 + $0xf78] sm:$0xff] %v672_v35 }
 0x1e7   :  { %1446 = vst [vmem:[%s3482_s1 + $0xff8] sm:$0x1f] %v527_v34 }
 0x1e8   :  { %913 = vst [vmem:[%s3482_s1 + $0x780] sm:$0xff] %v500_v38 }
 0x1e9   :  { %1431 = vst [vmem:[%s3482_s1 + $0xf80] sm:$0xff] %v500_v38 }
 0x1ea   :  { %914 = vst [vmem:[%s3482_s1 + $0x788] sm:$0xff] %v502_v40 }
 0x1eb   :  { %1432 = vst [vmem:[%s3482_s1 + $0xf88] sm:$0xff] %v502_v40 }
 0x1ec   :  { %915 = vst [vmem:[%s3482_s1 + $0x790] sm:$0xff] %v504_v42 }
 0x1ed   :  { %1433 = vst [vmem:[%s3482_s1 + $0xf90] sm:$0xff] %v504_v42 }
 0x1ee   :  { %916 = vst [vmem:[%s3482_s1 + $0x798] sm:$0xff] %v506_v44 }
 0x1ef   :  { %1434 = vst [vmem:[%s3482_s1 + $0xf98] sm:$0xff] %v506_v44 }
 0x1f0   :  { %917 = vst [vmem:[%s3482_s1 + $0x7a0] sm:$0xff] %v508_v46 }
 0x1f1   :  { %1435 = vst [vmem:[%s3482_s1 + $0xfa0] sm:$0xff] %v508_v46 }
 0x1f2   :  { %918 = vst [vmem:[%s3482_s1 + $0x7a8] sm:$0xff] %v510_v48 }
 0x1f3   :  { %1436 = vst [vmem:[%s3482_s1 + $0xfa8] sm:$0xff] %v510_v48 }
 0x1f4   :  { %919 = vst [vmem:[%s3482_s1 + $0x7b0] sm:$0xff] %v512_v50 }
 0x1f5   :  { %1437 = vst [vmem:[%s3482_s1 + $0xfb0] sm:$0xff] %v512_v50 }
 0x1f6   :  { %920 = vst [vmem:[%s3482_s1 + $0x7b8] sm:$0xff] %v514_v52 }
 0x1f7   :  { %1438 = vst [vmem:[%s3482_s1 + $0xfb8] sm:$0xff] %v514_v52 }
 0x1f8   :  { %921 = vst [vmem:[%s3482_s1 + $0x7c0] sm:$0xff] %v516_v54 }
 0x1f9   :  { %1439 = vst [vmem:[%s3482_s1 + $0xfc0] sm:$0xff] %v516_v54 }
 0x1fa   :  { %922 = vst [vmem:[%s3482_s1 + $0x7c8] sm:$0xff] %v518_v56 }
 0x1fb   :  { %1440 = vst [vmem:[%s3482_s1 + $0xfc8] sm:$0xff] %v518_v56 }
 0x1fc   :  { %923 = vst [vmem:[%s3482_s1 + $0x7d0] sm:$0xff] %v520_v58 }
 0x1fd   :  { %1441 = vst [vmem:[%s3482_s1 + $0xfd0] sm:$0xff] %v520_v58 }
 0x1fe   :  { %924 = vst [vmem:[%s3482_s1 + $0x7d8] sm:$0xff] %v522_v60 }
 0x1ff   :  { %1442 = vst [vmem:[%s3482_s1 + $0xfd8] sm:$0xff] %v522_v60 }
 0x200   :  { %925 = vst [vmem:[%s3482_s1 + $0x7e0] sm:$0xff] %v524_v61 }
 0x201   :  { %1443 = vst [vmem:[%s3482_s1 + $0xfe0] sm:$0xff] %v524_v61 }
 0x202   :  { %926 = vst [vmem:[%s3482_s1 + $0x7e8] sm:$0xff] %v526_v62 }
 0x203   :  { %1444 = vst [vmem:[%s3482_s1 + $0xfe8] sm:$0xff] %v526_v62 }
 0x204   :  { %927 = vst [vmem:[%s3482_s1 + $0x7f0] sm:$0xff] %v528_v63 }
 0x205   :  { %1445 = vst [vmem:[%s3482_s1 + $0xff0] sm:$0xff] %v528_v63 }
 0x206   :  { %1190 = vsyncpa [#allocation3], 1 }

</bundles_post_ra>
